<compile_context>
chip_gen: v5e
topology: v5e:2x2
jax: 0.10.0
libtpu: 0.0.40
codegen_flags: <defaults>
</compile_context>

<pallas_src>
import functools

import jax
import jax.numpy as jnp
from jax.experimental import pallas as pl
from jax.experimental.pallas import tpu as pltpu

_MIN_TILE = 1024     # never let chunking shrink the lane tile below this
_OUT_SUBLANES = 8    # per-chunk partial-sum output block
_OUT_LANES = 128


def _cdiv(a, b):
    return (a + b - 1) // b


def _round_up(a, b):
    return _cdiv(a, b) * b


def _default_num_chunks():
    """1 on single-TensorCore chips (v5e/v6e), 2 on dual-TC v7x."""
    try:
        kind = jax.devices()[0].device_kind.lower()
    except Exception:
        return 1
    return 2 if ("v7" in kind or "7x" in kind) else 1


@functools.partial(jax.jit, static_argnames=("tile_m_max", "num_chunks"))
def content_loss(sr_images, hr_images, weight, bias, *,
                 tile_m_max=8192, num_chunks=None):
    """MSE(relu(conv3x3(sr)+b), relu(conv3x3(hr)+b)) -- torch ContentLoss semantics.

    sr_images, hr_images: (N, C_in, H, W) float32 (NCHW, PyTorch convention)
    weight: (C_out, C_in, 3, 3) float32   bias: (C_out,) float32
    Returns a scalar float32.
    """
    n, c_in, h, w = sr_images.shape
    c_out = weight.shape[0]
    k = weight.shape[-1]
    assert k == 3, "kernel written for the 3x3 SAME conv of the synthetic model"

    hp, wp = h + 2, w + 2                 # spatially zero-padded extent
    mp = n * hp * wp                      # flattened padded pixel count
    halo = _round_up(wp + 1, 128)         # lane halo >= W+3 (covers all 9 taps)

    if num_chunks is None:
        num_chunks = _default_num_chunks()
    if num_chunks > 1 and _cdiv(mp, num_chunks) < _MIN_TILE:
        num_chunks = 1                    # splitting would only shrink lane tiles

    per_chunk = _cdiv(mp, num_chunks)
    steps = max(1, _cdiv(per_chunk, tile_m_max))
    tile_m = min(tile_m_max, _round_up(_cdiv(per_chunk, steps), 128))
    num_tiles = num_chunks * steps
    total_m = num_tiles * tile_m          # padded pixel axis (balanced chunks)
    tile_w = tile_m + 2 * halo            # per-tile lane width incl. halo

    def to_tiles(x):
        # (N, C, H, W) f32 -> (num_tiles, C, tile_w) bf16: channel-major,
        # pixel-flattened, spatially zero-padded, with a per-tile lane halo.
        xp = jnp.pad(x, ((0, 0), (0, 0), (1, 1), (1, 1)))            # (N,C,Hp,Wp)
        flat = jnp.transpose(xp, (1, 0, 2, 3)).reshape(c_in, mp)      # (C, Mp)
        flat = jnp.pad(flat, ((0, 0), (halo, halo + total_m - mp)))
        idx = (jnp.arange(num_tiles, dtype=jnp.int32)[:, None] * tile_m
               + jnp.arange(tile_w, dtype=jnp.int32)[None, :])        # (T, tile_w)
        tiles = jnp.transpose(flat[:, idx], (1, 0, 2))                 # (T, C, tile_w)
        return tiles.astype(jnp.bfloat16)

    sr_tiles = to_tiles(sr_images)
    hr_tiles = to_tiles(hr_images)

    # Per-output-pixel validity mask in the padded flattened layout: interior
    # pixels 1, spatial-padding positions and tile-grid padding 0.
    mask = jnp.pad(jnp.ones((n, h, w), jnp.bfloat16), ((0, 0), (1, 1), (1, 1)))
    mask = jnp.pad(mask.reshape(1, mp), ((0, 0), (0, total_m - mp)))

    # Per-tap weight slabs: (9, C_out, C_in), taps ordered (kh, kw).
    w_taps = jnp.transpose(weight, (2, 3, 0, 1)).reshape(k * k, c_out, c_in)
    w_taps = w_taps.astype(jnp.bfloat16)
    b_mat = bias.reshape(c_out, 1).astype(jnp.float32)

    # Static lane offsets of the 9 taps inside a haloed tile (dy outer, dx inner).
    tap_offsets = tuple(halo + dy * wp + dx
                        for dy in (-1, 0, 1) for dx in (-1, 0, 1))

    def kernel(sr_ref, hr_ref, mask_ref, w_ref, b_ref, o_ref, acc_ref):
        # sr_ref, hr_ref : (C_in, tile_w)  bf16 haloed pixel tiles
        # mask_ref       : (1, tile_m)     bf16 output-pixel validity
        # w_ref          : (9, C_out, C_in) bf16   b_ref: (C_out, 1) f32
        # o_ref          : (8, 128)        per-chunk partial-sum block
        # acc_ref        : (1, tile_m)     f32 accumulator
        s = pl.program_id(1)

        @pl.when(s == 0)
        def _():
            acc_ref[...] = jnp.zeros_like(acc_ref)

        b_vec = b_ref[...]

        def features(img_ref):
            acc = None
            for t, off in enumerate(tap_offsets):
                # Static lane-shifted slice (XLU rotate) fed straight to the MXU.
                part = jnp.dot(w_ref[t], img_ref[:, off:off + tile_m],
                               preferred_element_type=jnp.float32)
                acc = part if acc is None else acc + part
            return jnp.maximum(acc + b_vec, 0.0)           # (C_out, tile_m) f32

        d = features(sr_ref) - features(hr_ref)
        ssq = jnp.sum(d * d, axis=0, keepdims=True)        # sublane reduce -> (1, TM)
        acc_ref[...] += ssq * mask_ref[...].astype(jnp.float32)

        @pl.when(s == pl.num_programs(1) - 1)
        def _():
            chunk_total = jnp.sum(acc_ref[...], keepdims=True)        # (1, 1)
            o_ref[...] = jnp.broadcast_to(chunk_total, o_ref.shape)   # lane-dense store

    # Explicit scoped-VMEM budget: generous headroom, but capped safely below
    # v7x's 64 MiB physical VMEM (harmless on v5e/v6e's 128 MiB).
    est_vmem = (4 * c_in * tile_w * 2          # sr/hr, double-buffered, bf16
                + 2 * tile_m * 2               # mask, double-buffered, bf16
                + 8 * tile_m * 4               # acc scratch (padded to 8 sublanes)
                + 4 * c_out * tile_m * 4)      # f32 feature / diff temporaries
    vmem_limit = int(min(max(2 * est_vmem + (8 << 20), 32 << 20), 60 << 20))

    partials = pl.pallas_call(
        kernel,
        out_shape=jax.ShapeDtypeStruct(
            (num_chunks * _OUT_SUBLANES, _OUT_LANES), jnp.float32),
        grid_spec=pltpu.PrefetchScalarGridSpec(
            num_scalar_prefetch=0,
            grid=(num_chunks, steps),
            in_specs=[
                pl.BlockSpec((None, c_in, tile_w),
                             lambda c, s: (c * steps + s, 0, 0)),            # sr tiles
                pl.BlockSpec((None, c_in, tile_w),
                             lambda c, s: (c * steps + s, 0, 0)),            # hr tiles
                pl.BlockSpec((1, tile_m), lambda c, s: (0, c * steps + s)),  # mask
                pl.BlockSpec((k * k, c_out, c_in), lambda c, s: (0, 0, 0)),  # weight taps
                pl.BlockSpec((c_out, 1), lambda c, s: (0, 0)),               # bias
            ],
            out_specs=pl.BlockSpec((_OUT_SUBLANES, _OUT_LANES),
                                   lambda c, s: (c, 0)),
            scratch_shapes=[pltpu.VMEM((1, tile_m), jnp.float32)],
        ),
        compiler_params=pltpu.CompilerParams(
            dimension_semantics=("parallel", "arbitrary"),
            vmem_limit_bytes=vmem_limit),
    )(sr_tiles, hr_tiles, mask, w_taps, b_mat)

    # Each chunk's (8,128) block holds that chunk's masked sum of squared
    # feature differences; finish the sum + mean in plain JAX.
    chunk_sums = partials.reshape(num_chunks, _OUT_SUBLANES, _OUT_LANES)[:, 0, 0]
    total = jnp.sum(chunk_sums)
    return total / jnp.float32(n * c_out * h * w)   # MSELoss mean over numel


def _reference_loss(sr, hr, weight, bias):
    """Plain-JAX reference: MSE(relu(conv3x3(sr)+b), relu(conv3x3(hr)+b))."""
    def feat(x):
        y = jax.lax.conv_general_dilated(
            x, weight, window_strides=(1, 1), padding="SAME",
            dimension_numbers=("NCHW", "OIHW", "NCHW"),
            precision=jax.lax.Precision.HIGHEST)
        return jnp.maximum(y + bias[None, :, None, None], 0.0)
    d = feat(sr) - feat(hr)
    return jnp.mean(d * d)


if __name__ == "__main__":
    key = jax.random.PRNGKey(0)
    k_sr, k_hr, k_w, k_b = jax.random.split(key, 4)

    N, C_IN, H, W = 2, 4, 16, 16
    C_OUT, K = 8, 3

    sr = jax.random.normal(k_sr, (N, C_IN, H, W), dtype=jnp.float32)
    hr = jax.random.normal(k_hr, (N, C_IN, H, W), dtype=jnp.float32)

    # Deterministic synthetic "model": Conv2d(C_IN, C_OUT, 3, padding=1) + ReLU.
    fan_in = C_IN * K * K
    weight = jax.random.normal(
        k_w, (C_OUT, C_IN, K, K), dtype=jnp.float32) / jnp.sqrt(fan_in)
    bias = jax.random.normal(k_b, (C_OUT,), dtype=jnp.float32) * 0.1

    loss = content_loss(sr, hr, weight, bias)
    jax.block_until_ready(loss)

    ref = _reference_loss(sr, hr, weight, bias)
    assert loss.shape == () and bool(jnp.isfinite(loss))
    assert jnp.allclose(loss, ref, rtol=2e-2, atol=1e-5), (loss, ref)
    print("KERNEL_OK")
</pallas_src>

<mosaic_0001>
module attributes {stable_mosaic.version = 11 : i64} {
  func.func @kernel(%arg0: i32, %arg1: i32, %arg2: memref<1x4x1024xbf16, #tpu.memory_space<vmem>>, %arg3: memref<1x4x1024xbf16, #tpu.memory_space<vmem>>, %arg4: memref<1x768xbf16, #tpu.memory_space<vmem>>, %arg5: memref<9x8x4xbf16, #tpu.memory_space<vmem>>, %arg6: memref<8x1xf32, #tpu.memory_space<vmem>>, %arg7: memref<8x128xf32, #tpu.memory_space<vmem>>, %arg8: memref<1x768xf32, #tpu.memory_space<vmem>>) attributes {dimension_semantics = [#tpu.dimension_semantics<parallel>, #tpu.dimension_semantics<arbitrary>], iteration_bounds = array<i64: 1, 1>, scalar_prefetch = 0 : i64, scratch_operands = 1 : i64, tpu.core_type = #tpu.core_type<tc>, window_params = [{transform_indices = @transform_0, window_bounds = array<i64: 1, 4, 1024>}, {transform_indices = @transform_1, window_bounds = array<i64: 1, 4, 1024>}, {transform_indices = @transform_2, window_bounds = array<i64: 1, 768>}, {pipeline_mode = #tpu.pipeline_mode<synchronous>, transform_indices = @transform_3, window_bounds = array<i64: 9, 8, 4>}, {pipeline_mode = #tpu.pipeline_mode<synchronous>, transform_indices = @transform_4, window_bounds = array<i64: 8, 1>}, {transform_indices = @transform_5, window_bounds = array<i64: 8, 128>}]} {
    %c0_i32 = arith.constant 0 : i32
    %0 = arith.cmpi eq, %arg1, %c0_i32 : i32
    %1 = arith.extui %0 : i1 to i32
    %c0_i32_0 = arith.constant 0 : i32
    %2 = arith.cmpi ne, %1, %c0_i32_0 : i32
    scf.if %2 {
      %cst_121 = arith.constant 0.000000e+00 : f32
      %131 = vector.broadcast %cst_121 : f32 to vector<1x768xf32>
      %c0_122 = arith.constant 0 : index
      %c0_123 = arith.constant 0 : index
      %132 = vector.load %arg8[%c0_122, %c0_123] : memref<1x768xf32, #tpu.memory_space<vmem>>, vector<1x768xf32>
      tpu.vector_store %arg8[%c0_122, %c0_123], %131 {strides = array<i32>} : memref<1x768xf32, #tpu.memory_space<vmem>>, vector<1x768xf32>,
    } else {
    }
    %c0 = arith.constant 0 : index
    %c0_1 = arith.constant 0 : index
    %3 = vector.load %arg6[%c0, %c0_1] : memref<8x1xf32, #tpu.memory_space<vmem>>, vector<8x1xf32>
    %c0_2 = arith.constant 0 : index
    %c0_3 = arith.constant 0 : index
    %c0_4 = arith.constant 0 : index
    %4 = vector.load %arg5[%c0_2, %c0_3, %c0_4] : memref<9x8x4xbf16, #tpu.memory_space<vmem>>, vector<1x8x4xbf16>
    %5 = vector.shape_cast %4 : vector<1x8x4xbf16> to vector<8x4xbf16>
    %c0_5 = arith.constant 0 : index
    %c0_6 = arith.constant 0 : index
    %c109 = arith.constant 109 : index
    %6 = vector.load %arg2[%c0_5, %c0_6, %c109] : memref<1x4x1024xbf16, #tpu.memory_space<vmem>>, vector<1x4x768xbf16>
    %7 = vector.shape_cast %6 : vector<1x4x768xbf16> to vector<4x768xbf16>
    %cst = arith.constant dense<0.000000e+00> : vector<8x768xf32>
    %8 = tpu.matmul %5, %7, %cst {dimension_numbers = #tpu.dot_dimension_numbers<[1], [0], [0], [1], [0, 0, 1, 1], [], []>} : vector<8x4xbf16>, vector<4x768xbf16>, vector<8x768xf32> -> vector<8x768xf32>
    %c1 = arith.constant 1 : index
    %c0_7 = arith.constant 0 : index
    %c0_8 = arith.constant 0 : index
    %9 = vector.load %arg5[%c1, %c0_7, %c0_8] : memref<9x8x4xbf16, #tpu.memory_space<vmem>>, vector<1x8x4xbf16>
    %10 = vector.shape_cast %9 : vector<1x8x4xbf16> to vector<8x4xbf16>
    %c0_9 = arith.constant 0 : index
    %c0_10 = arith.constant 0 : index
    %c110 = arith.constant 110 : index
    %11 = vector.load %arg2[%c0_9, %c0_10, %c110] : memref<1x4x1024xbf16, #tpu.memory_space<vmem>>, vector<1x4x768xbf16>
    %12 = vector.shape_cast %11 : vector<1x4x768xbf16> to vector<4x768xbf16>
    %cst_11 = arith.constant dense<0.000000e+00> : vector<8x768xf32>
    %13 = tpu.matmul %10, %12, %cst_11 {dimension_numbers = #tpu.dot_dimension_numbers<[1], [0], [0], [1], [0, 0, 1, 1], [], []>} : vector<8x4xbf16>, vector<4x768xbf16>, vector<8x768xf32> -> vector<8x768xf32>
    %14 = arith.addf %8, %13 : vector<8x768xf32>
    %c2 = arith.constant 2 : index
    %c0_12 = arith.constant 0 : index
    %c0_13 = arith.constant 0 : index
    %15 = vector.load %arg5[%c2, %c0_12, %c0_13] : memref<9x8x4xbf16, #tpu.memory_space<vmem>>, vector<1x8x4xbf16>
    %16 = vector.shape_cast %15 : vector<1x8x4xbf16> to vector<8x4xbf16>
    %c0_14 = arith.constant 0 : index
    %c0_15 = arith.constant 0 : index
    %c111 = arith.constant 111 : index
    %17 = vector.load %arg2[%c0_14, %c0_15, %c111] : memref<1x4x1024xbf16, #tpu.memory_space<vmem>>, vector<1x4x768xbf16>
    %18 = vector.shape_cast %17 : vector<1x4x768xbf16> to vector<4x768xbf16>
    %cst_16 = arith.constant dense<0.000000e+00> : vector<8x768xf32>
    %19 = tpu.matmul %16, %18, %cst_16 {dimension_numbers = #tpu.dot_dimension_numbers<[1], [0], [0], [1], [0, 0, 1, 1], [], []>} : vector<8x4xbf16>, vector<4x768xbf16>, vector<8x768xf32> -> vector<8x768xf32>
    %20 = arith.addf %14, %19 : vector<8x768xf32>
    %c3 = arith.constant 3 : index
    %c0_17 = arith.constant 0 : index
    %c0_18 = arith.constant 0 : index
    %21 = vector.load %arg5[%c3, %c0_17, %c0_18] : memref<9x8x4xbf16, #tpu.memory_space<vmem>>, vector<1x8x4xbf16>
    %22 = vector.shape_cast %21 : vector<1x8x4xbf16> to vector<8x4xbf16>
    %c0_19 = arith.constant 0 : index
    %c0_20 = arith.constant 0 : index
    %c127 = arith.constant 127 : index
    %23 = vector.load %arg2[%c0_19, %c0_20, %c127] : memref<1x4x1024xbf16, #tpu.memory_space<vmem>>, vector<1x4x768xbf16>
    %24 = vector.shape_cast %23 : vector<1x4x768xbf16> to vector<4x768xbf16>
    %cst_21 = arith.constant dense<0.000000e+00> : vector<8x768xf32>
    %25 = tpu.matmul %22, %24, %cst_21 {dimension_numbers = #tpu.dot_dimension_numbers<[1], [0], [0], [1], [0, 0, 1, 1], [], []>} : vector<8x4xbf16>, vector<4x768xbf16>, vector<8x768xf32> -> vector<8x768xf32>
    %26 = arith.addf %20, %25 : vector<8x768xf32>
    %c4 = arith.constant 4 : index
    %c0_22 = arith.constant 0 : index
    %c0_23 = arith.constant 0 : index
    %27 = vector.load %arg5[%c4, %c0_22, %c0_23] : memref<9x8x4xbf16, #tpu.memory_space<vmem>>, vector<1x8x4xbf16>
    %28 = vector.shape_cast %27 : vector<1x8x4xbf16> to vector<8x4xbf16>
    %c0_24 = arith.constant 0 : index
    %c0_25 = arith.constant 0 : index
    %c128 = arith.constant 128 : index
    %29 = vector.load %arg2[%c0_24, %c0_25, %c128] : memref<1x4x1024xbf16, #tpu.memory_space<vmem>>, vector<1x4x768xbf16>
    %30 = vector.shape_cast %29 : vector<1x4x768xbf16> to vector<4x768xbf16>
    %cst_26 = arith.constant dense<0.000000e+00> : vector<8x768xf32>
    %31 = tpu.matmul %28, %30, %cst_26 {dimension_numbers = #tpu.dot_dimension_numbers<[1], [0], [0], [1], [0, 0, 1, 1], [], []>} : vector<8x4xbf16>, vector<4x768xbf16>, vector<8x768xf32> -> vector<8x768xf32>
    %32 = arith.addf %26, %31 : vector<8x768xf32>
    %c5 = arith.constant 5 : index
    %c0_27 = arith.constant 0 : index
    %c0_28 = arith.constant 0 : index
    %33 = vector.load %arg5[%c5, %c0_27, %c0_28] : memref<9x8x4xbf16, #tpu.memory_space<vmem>>, vector<1x8x4xbf16>
    %34 = vector.shape_cast %33 : vector<1x8x4xbf16> to vector<8x4xbf16>
    %c0_29 = arith.constant 0 : index
    %c0_30 = arith.constant 0 : index
    %c129 = arith.constant 129 : index
    %35 = vector.load %arg2[%c0_29, %c0_30, %c129] : memref<1x4x1024xbf16, #tpu.memory_space<vmem>>, vector<1x4x768xbf16>
    %36 = vector.shape_cast %35 : vector<1x4x768xbf16> to vector<4x768xbf16>
    %cst_31 = arith.constant dense<0.000000e+00> : vector<8x768xf32>
    %37 = tpu.matmul %34, %36, %cst_31 {dimension_numbers = #tpu.dot_dimension_numbers<[1], [0], [0], [1], [0, 0, 1, 1], [], []>} : vector<8x4xbf16>, vector<4x768xbf16>, vector<8x768xf32> -> vector<8x768xf32>
    %38 = arith.addf %32, %37 : vector<8x768xf32>
    %c6 = arith.constant 6 : index
    %c0_32 = arith.constant 0 : index
    %c0_33 = arith.constant 0 : index
    %39 = vector.load %arg5[%c6, %c0_32, %c0_33] : memref<9x8x4xbf16, #tpu.memory_space<vmem>>, vector<1x8x4xbf16>
    %40 = vector.shape_cast %39 : vector<1x8x4xbf16> to vector<8x4xbf16>
    %c0_34 = arith.constant 0 : index
    %c0_35 = arith.constant 0 : index
    %c145 = arith.constant 145 : index
    %41 = vector.load %arg2[%c0_34, %c0_35, %c145] : memref<1x4x1024xbf16, #tpu.memory_space<vmem>>, vector<1x4x768xbf16>
    %42 = vector.shape_cast %41 : vector<1x4x768xbf16> to vector<4x768xbf16>
    %cst_36 = arith.constant dense<0.000000e+00> : vector<8x768xf32>
    %43 = tpu.matmul %40, %42, %cst_36 {dimension_numbers = #tpu.dot_dimension_numbers<[1], [0], [0], [1], [0, 0, 1, 1], [], []>} : vector<8x4xbf16>, vector<4x768xbf16>, vector<8x768xf32> -> vector<8x768xf32>
    %44 = arith.addf %38, %43 : vector<8x768xf32>
    %c7 = arith.constant 7 : index
    %c0_37 = arith.constant 0 : index
    %c0_38 = arith.constant 0 : index
    %45 = vector.load %arg5[%c7, %c0_37, %c0_38] : memref<9x8x4xbf16, #tpu.memory_space<vmem>>, vector<1x8x4xbf16>
    %46 = vector.shape_cast %45 : vector<1x8x4xbf16> to vector<8x4xbf16>
    %c0_39 = arith.constant 0 : index
    %c0_40 = arith.constant 0 : index
    %c146 = arith.constant 146 : index
    %47 = vector.load %arg2[%c0_39, %c0_40, %c146] : memref<1x4x1024xbf16, #tpu.memory_space<vmem>>, vector<1x4x768xbf16>
    %48 = vector.shape_cast %47 : vector<1x4x768xbf16> to vector<4x768xbf16>
    %cst_41 = arith.constant dense<0.000000e+00> : vector<8x768xf32>
    %49 = tpu.matmul %46, %48, %cst_41 {dimension_numbers = #tpu.dot_dimension_numbers<[1], [0], [0], [1], [0, 0, 1, 1], [], []>} : vector<8x4xbf16>, vector<4x768xbf16>, vector<8x768xf32> -> vector<8x768xf32>
    %50 = arith.addf %44, %49 : vector<8x768xf32>
    %c8 = arith.constant 8 : index
    %c0_42 = arith.constant 0 : index
    %c0_43 = arith.constant 0 : index
    %51 = vector.load %arg5[%c8, %c0_42, %c0_43] : memref<9x8x4xbf16, #tpu.memory_space<vmem>>, vector<1x8x4xbf16>
    %52 = vector.shape_cast %51 : vector<1x8x4xbf16> to vector<8x4xbf16>
    %c0_44 = arith.constant 0 : index
    %c0_45 = arith.constant 0 : index
    %c147 = arith.constant 147 : index
    %53 = vector.load %arg2[%c0_44, %c0_45, %c147] : memref<1x4x1024xbf16, #tpu.memory_space<vmem>>, vector<1x4x768xbf16>
    %54 = vector.shape_cast %53 : vector<1x4x768xbf16> to vector<4x768xbf16>
    %cst_46 = arith.constant dense<0.000000e+00> : vector<8x768xf32>
    %55 = tpu.matmul %52, %54, %cst_46 {dimension_numbers = #tpu.dot_dimension_numbers<[1], [0], [0], [1], [0, 0, 1, 1], [], []>} : vector<8x4xbf16>, vector<4x768xbf16>, vector<8x768xf32> -> vector<8x768xf32>
    %56 = arith.addf %50, %55 : vector<8x768xf32>
    %57 = vector.broadcast %3 : vector<8x1xf32> to vector<8x768xf32>
    %58 = arith.addf %56, %57 : vector<8x768xf32>
    %cst_47 = arith.constant 0.000000e+00 : f32
    %59 = vector.broadcast %cst_47 : f32 to vector<8x768xf32>
    %60 = arith.maximumf %58, %59 : vector<8x768xf32>
    %c0_48 = arith.constant 0 : index
    %c0_49 = arith.constant 0 : index
    %c0_50 = arith.constant 0 : index
    %61 = vector.load %arg5[%c0_48, %c0_49, %c0_50] : memref<9x8x4xbf16, #tpu.memory_space<vmem>>, vector<1x8x4xbf16>
    %62 = vector.shape_cast %61 : vector<1x8x4xbf16> to vector<8x4xbf16>
    %c0_51 = arith.constant 0 : index
    %c0_52 = arith.constant 0 : index
    %c109_53 = arith.constant 109 : index
    %63 = vector.load %arg3[%c0_51, %c0_52, %c109_53] : memref<1x4x1024xbf16, #tpu.memory_space<vmem>>, vector<1x4x768xbf16>
    %64 = vector.shape_cast %63 : vector<1x4x768xbf16> to vector<4x768xbf16>
    %cst_54 = arith.constant dense<0.000000e+00> : vector<8x768xf32>
    %65 = tpu.matmul %62, %64, %cst_54 {dimension_numbers = #tpu.dot_dimension_numbers<[1], [0], [0], [1], [0, 0, 1, 1], [], []>} : vector<8x4xbf16>, vector<4x768xbf16>, vector<8x768xf32> -> vector<8x768xf32>
    %c1_55 = arith.constant 1 : index
    %c0_56 = arith.constant 0 : index
    %c0_57 = arith.constant 0 : index
    %66 = vector.load %arg5[%c1_55, %c0_56, %c0_57] : memref<9x8x4xbf16, #tpu.memory_space<vmem>>, vector<1x8x4xbf16>
    %67 = vector.shape_cast %66 : vector<1x8x4xbf16> to vector<8x4xbf16>
    %c0_58 = arith.constant 0 : index
    %c0_59 = arith.constant 0 : index
    %c110_60 = arith.constant 110 : index
    %68 = vector.load %arg3[%c0_58, %c0_59, %c110_60] : memref<1x4x1024xbf16, #tpu.memory_space<vmem>>, vector<1x4x768xbf16>
    %69 = vector.shape_cast %68 : vector<1x4x768xbf16> to vector<4x768xbf16>
    %cst_61 = arith.constant dense<0.000000e+00> : vector<8x768xf32>
    %70 = tpu.matmul %67, %69, %cst_61 {dimension_numbers = #tpu.dot_dimension_numbers<[1], [0], [0], [1], [0, 0, 1, 1], [], []>} : vector<8x4xbf16>, vector<4x768xbf16>, vector<8x768xf32> -> vector<8x768xf32>
    %71 = arith.addf %65, %70 : vector<8x768xf32>
    %c2_62 = arith.constant 2 : index
    %c0_63 = arith.constant 0 : index
    %c0_64 = arith.constant 0 : index
    %72 = vector.load %arg5[%c2_62, %c0_63, %c0_64] : memref<9x8x4xbf16, #tpu.memory_space<vmem>>, vector<1x8x4xbf16>
    %73 = vector.shape_cast %72 : vector<1x8x4xbf16> to vector<8x4xbf16>
    %c0_65 = arith.constant 0 : index
    %c0_66 = arith.constant 0 : index
    %c111_67 = arith.constant 111 : index
    %74 = vector.load %arg3[%c0_65, %c0_66, %c111_67] : memref<1x4x1024xbf16, #tpu.memory_space<vmem>>, vector<1x4x768xbf16>
    %75 = vector.shape_cast %74 : vector<1x4x768xbf16> to vector<4x768xbf16>
    %cst_68 = arith.constant dense<0.000000e+00> : vector<8x768xf32>
    %76 = tpu.matmul %73, %75, %cst_68 {dimension_numbers = #tpu.dot_dimension_numbers<[1], [0], [0], [1], [0, 0, 1, 1], [], []>} : vector<8x4xbf16>, vector<4x768xbf16>, vector<8x768xf32> -> vector<8x768xf32>
    %77 = arith.addf %71, %76 : vector<8x768xf32>
    %c3_69 = arith.constant 3 : index
    %c0_70 = arith.constant 0 : index
    %c0_71 = arith.constant 0 : index
    %78 = vector.load %arg5[%c3_69, %c0_70, %c0_71] : memref<9x8x4xbf16, #tpu.memory_space<vmem>>, vector<1x8x4xbf16>
    %79 = vector.shape_cast %78 : vector<1x8x4xbf16> to vector<8x4xbf16>
    %c0_72 = arith.constant 0 : index
    %c0_73 = arith.constant 0 : index
    %c127_74 = arith.constant 127 : index
    %80 = vector.load %arg3[%c0_72, %c0_73, %c127_74] : memref<1x4x1024xbf16, #tpu.memory_space<vmem>>, vector<1x4x768xbf16>
    %81 = vector.shape_cast %80 : vector<1x4x768xbf16> to vector<4x768xbf16>
    %cst_75 = arith.constant dense<0.000000e+00> : vector<8x768xf32>
    %82 = tpu.matmul %79, %81, %cst_75 {dimension_numbers = #tpu.dot_dimension_numbers<[1], [0], [0], [1], [0, 0, 1, 1], [], []>} : vector<8x4xbf16>, vector<4x768xbf16>, vector<8x768xf32> -> vector<8x768xf32>
    %83 = arith.addf %77, %82 : vector<8x768xf32>
    %c4_76 = arith.constant 4 : index
    %c0_77 = arith.constant 0 : index
    %c0_78 = arith.constant 0 : index
    %84 = vector.load %arg5[%c4_76, %c0_77, %c0_78] : memref<9x8x4xbf16, #tpu.memory_space<vmem>>, vector<1x8x4xbf16>
    %85 = vector.shape_cast %84 : vector<1x8x4xbf16> to vector<8x4xbf16>
    %c0_79 = arith.constant 0 : index
    %c0_80 = arith.constant 0 : index
    %c128_81 = arith.constant 128 : index
    %86 = vector.load %arg3[%c0_79, %c0_80, %c128_81] : memref<1x4x1024xbf16, #tpu.memory_space<vmem>>, vector<1x4x768xbf16>
    %87 = vector.shape_cast %86 : vector<1x4x768xbf16> to vector<4x768xbf16>
    %cst_82 = arith.constant dense<0.000000e+00> : vector<8x768xf32>
    %88 = tpu.matmul %85, %87, %cst_82 {dimension_numbers = #tpu.dot_dimension_numbers<[1], [0], [0], [1], [0, 0, 1, 1], [], []>} : vector<8x4xbf16>, vector<4x768xbf16>, vector<8x768xf32> -> vector<8x768xf32>
    %89 = arith.addf %83, %88 : vector<8x768xf32>
    %c5_83 = arith.constant 5 : index
    %c0_84 = arith.constant 0 : index
    %c0_85 = arith.constant 0 : index
    %90 = vector.load %arg5[%c5_83, %c0_84, %c0_85] : memref<9x8x4xbf16, #tpu.memory_space<vmem>>, vector<1x8x4xbf16>
    %91 = vector.shape_cast %90 : vector<1x8x4xbf16> to vector<8x4xbf16>
    %c0_86 = arith.constant 0 : index
    %c0_87 = arith.constant 0 : index
    %c129_88 = arith.constant 129 : index
    %92 = vector.load %arg3[%c0_86, %c0_87, %c129_88] : memref<1x4x1024xbf16, #tpu.memory_space<vmem>>, vector<1x4x768xbf16>
    %93 = vector.shape_cast %92 : vector<1x4x768xbf16> to vector<4x768xbf16>
    %cst_89 = arith.constant dense<0.000000e+00> : vector<8x768xf32>
    %94 = tpu.matmul %91, %93, %cst_89 {dimension_numbers = #tpu.dot_dimension_numbers<[1], [0], [0], [1], [0, 0, 1, 1], [], []>} : vector<8x4xbf16>, vector<4x768xbf16>, vector<8x768xf32> -> vector<8x768xf32>
    %95 = arith.addf %89, %94 : vector<8x768xf32>
    %c6_90 = arith.constant 6 : index
    %c0_91 = arith.constant 0 : index
    %c0_92 = arith.constant 0 : index
    %96 = vector.load %arg5[%c6_90, %c0_91, %c0_92] : memref<9x8x4xbf16, #tpu.memory_space<vmem>>, vector<1x8x4xbf16>
    %97 = vector.shape_cast %96 : vector<1x8x4xbf16> to vector<8x4xbf16>
    %c0_93 = arith.constant 0 : index
    %c0_94 = arith.constant 0 : index
    %c145_95 = arith.constant 145 : index
    %98 = vector.load %arg3[%c0_93, %c0_94, %c145_95] : memref<1x4x1024xbf16, #tpu.memory_space<vmem>>, vector<1x4x768xbf16>
    %99 = vector.shape_cast %98 : vector<1x4x768xbf16> to vector<4x768xbf16>
    %cst_96 = arith.constant dense<0.000000e+00> : vector<8x768xf32>
    %100 = tpu.matmul %97, %99, %cst_96 {dimension_numbers = #tpu.dot_dimension_numbers<[1], [0], [0], [1], [0, 0, 1, 1], [], []>} : vector<8x4xbf16>, vector<4x768xbf16>, vector<8x768xf32> -> vector<8x768xf32>
    %101 = arith.addf %95, %100 : vector<8x768xf32>
    %c7_97 = arith.constant 7 : index
    %c0_98 = arith.constant 0 : index
    %c0_99 = arith.constant 0 : index
    %102 = vector.load %arg5[%c7_97, %c0_98, %c0_99] : memref<9x8x4xbf16, #tpu.memory_space<vmem>>, vector<1x8x4xbf16>
    %103 = vector.shape_cast %102 : vector<1x8x4xbf16> to vector<8x4xbf16>
    %c0_100 = arith.constant 0 : index
    %c0_101 = arith.constant 0 : index
    %c146_102 = arith.constant 146 : index
    %104 = vector.load %arg3[%c0_100, %c0_101, %c146_102] : memref<1x4x1024xbf16, #tpu.memory_space<vmem>>, vector<1x4x768xbf16>
    %105 = vector.shape_cast %104 : vector<1x4x768xbf16> to vector<4x768xbf16>
    %cst_103 = arith.constant dense<0.000000e+00> : vector<8x768xf32>
    %106 = tpu.matmul %103, %105, %cst_103 {dimension_numbers = #tpu.dot_dimension_numbers<[1], [0], [0], [1], [0, 0, 1, 1], [], []>} : vector<8x4xbf16>, vector<4x768xbf16>, vector<8x768xf32> -> vector<8x768xf32>
    %107 = arith.addf %101, %106 : vector<8x768xf32>
    %c8_104 = arith.constant 8 : index
    %c0_105 = arith.constant 0 : index
    %c0_106 = arith.constant 0 : index
    %108 = vector.load %arg5[%c8_104, %c0_105, %c0_106] : memref<9x8x4xbf16, #tpu.memory_space<vmem>>, vector<1x8x4xbf16>
    %109 = vector.shape_cast %108 : vector<1x8x4xbf16> to vector<8x4xbf16>
    %c0_107 = arith.constant 0 : index
    %c0_108 = arith.constant 0 : index
    %c147_109 = arith.constant 147 : index
    %110 = vector.load %arg3[%c0_107, %c0_108, %c147_109] : memref<1x4x1024xbf16, #tpu.memory_space<vmem>>, vector<1x4x768xbf16>
    %111 = vector.shape_cast %110 : vector<1x4x768xbf16> to vector<4x768xbf16>
    %cst_110 = arith.constant dense<0.000000e+00> : vector<8x768xf32>
    %112 = tpu.matmul %109, %111, %cst_110 {dimension_numbers = #tpu.dot_dimension_numbers<[1], [0], [0], [1], [0, 0, 1, 1], [], []>} : vector<8x4xbf16>, vector<4x768xbf16>, vector<8x768xf32> -> vector<8x768xf32>
    %113 = arith.addf %107, %112 : vector<8x768xf32>
    %114 = vector.broadcast %3 : vector<8x1xf32> to vector<8x768xf32>
    %115 = arith.addf %113, %114 : vector<8x768xf32>
    %cst_111 = arith.constant 0.000000e+00 : f32
    %116 = vector.broadcast %cst_111 : f32 to vector<8x768xf32>
    %117 = arith.maximumf %115, %116 : vector<8x768xf32>
    %118 = arith.subf %60, %117 : vector<8x768xf32>
    %119 = arith.mulf %118, %118 : vector<8x768xf32>
    %cst_112 = arith.constant dense<0.000000e+00> : vector<768xf32>
    %120 = vector.multi_reduction <add>, %119, %cst_112 [0] : vector<8x768xf32> to vector<768xf32>
    %121 = vector.shape_cast %120 : vector<768xf32> to vector<1x768xf32>
    %c0_113 = arith.constant 0 : index
    %c0_114 = arith.constant 0 : index
    %122 = vector.load %arg8[%c0_113, %c0_114] : memref<1x768xf32, #tpu.memory_space<vmem>>, vector<1x768xf32>
    %c0_115 = arith.constant 0 : index
    %c0_116 = arith.constant 0 : index
    %123 = vector.load %arg4[%c0_115, %c0_116] : memref<1x768xbf16, #tpu.memory_space<vmem>>, vector<1x768xbf16>
    %124 = arith.extf %123 : vector<1x768xbf16> to vector<1x768xf32>
    %125 = arith.mulf %121, %124 : vector<1x768xf32>
    %126 = arith.addf %122, %125 : vector<1x768xf32>
    %c0_117 = arith.constant 0 : index
    %c0_118 = arith.constant 0 : index
    %127 = vector.load %arg8[%c0_117, %c0_118] : memref<1x768xf32, #tpu.memory_space<vmem>>, vector<1x768xf32>
    tpu.vector_store %arg8[%c0_117, %c0_118], %126 {strides = array<i32>} : memref<1x768xf32, #tpu.memory_space<vmem>>, vector<1x768xf32>,
    %c0_i32_119 = arith.constant 0 : i32
    %128 = arith.cmpi eq, %arg1, %c0_i32_119 : i32
    %129 = arith.extui %128 : i1 to i32
    %c0_i32_120 = arith.constant 0 : i32
    %130 = arith.cmpi ne, %129, %c0_i32_120 : i32
    scf.if %130 {
      %c0_121 = arith.constant 0 : index
      %c0_122 = arith.constant 0 : index
      %131 = vector.load %arg8[%c0_121, %c0_122] : memref<1x768xf32, #tpu.memory_space<vmem>>, vector<1x768xf32>
      %132 = vector.shape_cast %131 : vector<1x768xf32> to vector<1x1x768xf32>
      %cst_123 = arith.constant dense<0.000000e+00> : vector<1xf32>
      %133 = vector.multi_reduction <add>, %132, %cst_123 [1, 2] : vector<1x1x768xf32> to vector<1xf32>
      %134 = vector.shape_cast %133 : vector<1xf32> to vector<1x1x1xf32>
      %135 = vector.extract %134[0, 0, 0] : f32 from vector<1x1x1xf32>
      %136 = vector.broadcast %135 : f32 to vector<1x1xf32>
      %137 = vector.shape_cast %136 : vector<1x1xf32> to vector<1x1xf32>
      %138 = vector.broadcast %137 : vector<1x1xf32> to vector<8x128xf32>
      %c0_124 = arith.constant 0 : index
      %c0_125 = arith.constant 0 : index
      %139 = vector.load %arg7[%c0_124, %c0_125] : memref<8x128xf32, #tpu.memory_space<vmem>>, vector<8x128xf32>
      tpu.vector_store %arg7[%c0_124, %c0_125], %138 {strides = array<i32>} : memref<8x128xf32, #tpu.memory_space<vmem>>, vector<8x128xf32>,
    } else {
    }
    return
  }
  func.func @transform_0(%arg0: i32, %arg1: i32) -> (i32, i32, i32) {
    %c1_i32 = arith.constant 1 : i32
    %0 = arith.muli %arg0, %c1_i32 : i32
    %1 = arith.addi %0, %arg1 : i32
    %c0_i32 = arith.constant 0 : i32
    %c0_i32_0 = arith.constant 0 : i32
    %c0_i32_1 = arith.constant 0 : i32
    return %1, %c0_i32, %c0_i32_0 : i32, i32, i32
  }
  func.func @transform_1(%arg0: i32, %arg1: i32) -> (i32, i32, i32) {
    %c1_i32 = arith.constant 1 : i32
    %0 = arith.muli %arg0, %c1_i32 : i32
    %1 = arith.addi %0, %arg1 : i32
    %c0_i32 = arith.constant 0 : i32
    %c0_i32_0 = arith.constant 0 : i32
    %c0_i32_1 = arith.constant 0 : i32
    return %1, %c0_i32, %c0_i32_0 : i32, i32, i32
  }
  func.func @transform_2(%arg0: i32, %arg1: i32) -> (i32, i32) {
    %c1_i32 = arith.constant 1 : i32
    %0 = arith.muli %arg0, %c1_i32 : i32
    %1 = arith.addi %0, %arg1 : i32
    %c0_i32 = arith.constant 0 : i32
    %c0_i32_0 = arith.constant 0 : i32
    return %c0_i32, %1 : i32, i32
  }
  func.func @transform_3(%arg0: i32, %arg1: i32) -> (i32, i32, i32) {
    %c0_i32 = arith.constant 0 : i32
    %c0_i32_0 = arith.constant 0 : i32
    %c0_i32_1 = arith.constant 0 : i32
    %c0_i32_2 = arith.constant 0 : i32
    return %c0_i32, %c0_i32_0, %c0_i32_1 : i32, i32, i32
  }
  func.func @transform_4(%arg0: i32, %arg1: i32) -> (i32, i32) {
    %c0_i32 = arith.constant 0 : i32
    %c0_i32_0 = arith.constant 0 : i32
    %c0_i32_1 = arith.constant 0 : i32
    return %c0_i32, %c0_i32_0 : i32, i32
  }
  func.func @transform_5(%arg0: i32, %arg1: i32) -> (i32, i32) {
    %c0_i32 = arith.constant 0 : i32
    %c0_i32_0 = arith.constant 0 : i32
    return %arg0, %c0_i32 : i32, i32
  }
}

</mosaic_0001>

<bundles_post_ra>
// kernel: content_loss.1
= control target key start
LH: loop header
LB: loop body
LE: loop exit
PB: predicated region body
PF: predicated region fallthrough
CT: control target
= control target key end

     0   :  { %s2940_s22 = smov 18   ;;  %s2941_s25 = smov 19   ;;  %vm128_vm0 = vcmask 146432   ;;  %vm139_vm1 = vcmask 1041408   ;;  %vm135_vm2 = vcmask 31744   ;;  %vm267_vm3 = vcmask 154624   ;;  %s3788_s0 = inlined_call_operand.vmem [shape: bf16[1,4,1024], index: 0, kind: input, shape index: {}]   ;;  %s3789_s3 = inlined_call_operand.vmem [shape: bf16[9,8,4], index: 3, kind: input, shape index: {}]   ;;  %s3790_s1 = inlined_call_operand.vmem [shape: bf16[1,4,1024], index: 1, kind: input, shape index: {}]   ;;  %s3791_s4 = inlined_call_operand.vmem [shape: f32[8,1], index: 4, kind: input, shape index: {}]   ;;  %s3792_s2 = inlined_call_operand.vmem [shape: bf16[1,768], index: 2, kind: input, shape index: {}]   ;;  %s3793_s5 = inlined_call_operand.vmem [shape: f32[8,128], index: 5, kind: output, shape index: {}]  }
   0x1   :  { %v92_v0 = vld [vmem:[%s3788_s0 + $0x8] sm:$0x3f]  ;;  %v91_v1 = vld [vmem:[%s3788_s0] sm:$0xff]  ;;  %s2942_s28 = smov 17   ;;  %s2943_s6 = smov 1   ;;  %vm410_vm4 = vcmask 138240  }
   0x2   :  { %99 = vst [vmem:[#allocation1 + $0x20] ss:$4 sm:$0xff] %v92_v0  ;;  %v376_v9 = vld [vmem:[%s3788_s0 + $0x8] sm:$0x3f]  ;;  %s2944_s11 = smov 127   ;;  %s2945_s14 = smov 111  }
   0x3   :  { %96 = vst [vmem:[#allocation1] ss:$4 sm:$0xff] %v91_v1  ;;  %v525_v24 = vld [vmem:[%s3788_s0 + $0x8] sm:$0x3f]  ;;  %s2946_s15 = smov 110   ;;  %s2947_s20 = smov 109  }
   0x4   :  { %v3010_v25 = vld [vmem:[%s3788_s0 + $0x2] sm:$0xff]  ;;  %v674_v37 = vld [vmem:[%s3788_s0 + $0xa] sm:$0xf]  ;;  %vm559_vm5 = vcmask 7168   ;;  %vm822_vm6 = vcmask 1039360   ;;  %vm971_vm7 = vcmask 908288  }
   0x5   :  { %v788_v38 = vld [vmem:[%s3788_s0 + $0xa] sm:$0x3f]  ;;  %vm1120_vm8 = vcmask 900096   ;;  %vm1269_vm9 = vcmask 891904   ;;  %vm2730_vm11 = vcmask 1040384   ;;  %vm2733_vm12 = vcmask 1043459  }
   0x6   :  { %v937_v49 = vld [vmem:[%s3788_s0 + $0xa] sm:$0x3f]  ;;  %vm2735_vm13 = vcmask 1044483   ;;  %vm2737_vm14 = vcmask 1042432  }
   0x9   :  { %v108_v2 = vld.sshfl [vmem:[#allocation1 + $0x20] sm:$0xff pattern:$0x73625140]  ;;  %v110_v3 = vld.sshfl [vmem:[#allocation1 + $0x28] sm:$0xff pattern:$0x73625140] }
   0xa   :  { %v112_v4 = vld.sshfl [vmem:[#allocation1 + $0x30] sm:$0xff pattern:$0x73625140]  ;;  %122 = vrot.lane.b32.xlu1 %v108_v2, %s2940_s22  ;;  %v106_v6 = vld.sshfl [vmem:[#allocation1 + $0x18] sm:$0xff pattern:$0x73625140] }
   0xb   :  { %v104_v5 = vld.sshfl [vmem:[#allocation1 + $0x10] sm:$0xff pattern:$0x73625140]  ;;  %238 = vst [vmem:[#allocation1 + $0x20] ss:$4 sm:$0xff] %v92_v0 }
   0xc   :  { %118 = vrot.lane.b32.xlu0 %v104_v5, %s2940_s22  ;;  %v102_v7 = vld.sshfl [vmem:[#allocation1 + $0x8] sm:$0xff pattern:$0x73625140]  ;;  %v100_v8 = vld.sshfl [vmem:[#allocation1] sm:$0xff pattern:$0x73625140] }
   0xd   :  { %114 = vrot.lane.b32.xlu2 %v100_v8, %s2940_s22  ;;  %236 = vst [vmem:[#allocation1] ss:$4 sm:$0xff] %v91_v1  ;;  %v1086_v0 = vld [vmem:[%s3788_s0 + $0xa] sm:$0x3f] }
  0x12   :  { %116 = vrot.lane.b32.xlu1 %v102_v7, %s2940_s22  ;;  %v249_v10 = vld.sshfl [vmem:[#allocation1 + $0x28] sm:$0xff pattern:$0x73625140]  ;;  %v251_v11 = vld.sshfl [vmem:[#allocation1 + $0x30] sm:$0xff pattern:$0x73625140] }
  0x13   :  { %v247_v13 = vld.sshfl [vmem:[#allocation1 + $0x20] sm:$0xff pattern:$0x73625140] }
  0x14   :  { %120 = vrot.lane.b32.xlu0 %v106_v6, %s2940_s22  ;;  %v243_v12 = vld.sshfl [vmem:[#allocation1 + $0x10] sm:$0xff pattern:$0x73625140]  ;;  %v239_v14 = vld.sshfl [vmem:[#allocation1] sm:$0xff pattern:$0x73625140] }
  0x15   :  { %v245_v15 = vld.sshfl [vmem:[#allocation1 + $0x18] sm:$0xff pattern:$0x73625140]  ;;  %v241_v16 = vld.sshfl [vmem:[#allocation1 + $0x8] sm:$0xff pattern:$0x73625140]  ;;  %253 = vrot.lane.b32.xlu2 %v239_v14, %s2941_s25 }
  0x16   :  { %381 = vst [vmem:[#allocation1 + $0x20] ss:$4 sm:$0xff] %v376_v9 }
  0x17   :  { %378 = vst [vmem:[#allocation1] ss:$4 sm:$0xff] %v91_v1 }
  0x1a   :  { %257 = vrot.lane.b32.xlu1 %v243_v12, %s2941_s25 }
  0x1c   :  { %255 = vrot.lane.b32.xlu0 %v241_v16, %s2941_s25 }
  0x1d   :  { %124 = vrot.lane.b32.xlu2 %v110_v3, %s2940_s22  ;;  %v394_v21 = vld.sshfl [vmem:[#allocation1 + $0x30] sm:$0xff pattern:$0x73625140]  ;;  %v390_v22 = vld.sshfl [vmem:[#allocation1 + $0x20] sm:$0xff pattern:$0x73625140] }
  0x1e   :  { %v388_v17 = vld.sshfl [vmem:[#allocation1 + $0x18] sm:$0xff pattern:$0x73625140]  ;;  %v384_v18 = vld.sshfl [vmem:[#allocation1 + $0x8] sm:$0xff pattern:$0x73625140] }
  0x1f   :  { %v386_v19 = vld.sshfl [vmem:[#allocation1 + $0x10] sm:$0xff pattern:$0x73625140]  ;;  %v382_v20 = vld.sshfl [vmem:[#allocation1] sm:$0xff pattern:$0x73625140] }
  0x20   :  { %527 = vst [vmem:[#allocation1] ss:$4 sm:$0xff] %v91_v1  ;;  %v392_v23 = vld.sshfl [vmem:[#allocation1 + $0x28] sm:$0xff pattern:$0x73625140] }
  0x21   :  { %530 = vst [vmem:[#allocation1 + $0x20] ss:$4 sm:$0xff] %v525_v24 }
  0x22   :  { %261 = vrot.lane.b32.xlu1 %v247_v13, %s2941_s25  ;;  %v2804_v13 = vld [vmem:[%s3789_s3 + $0x4] sm:$0xf] }
  0x24   :  { %126 = vrot.lane.b32.xlu0 %v112_v4, %s2940_s22 }
  0x25   :  { %263 = vrot.lane.b32.xlu2 %v249_v10, %s2941_s25 }
  0x27   :  { %v531_v26 = vld.sshfl [vmem:[#allocation1] sm:$0xff pattern:$0x73625140]  ;;  %v535_v27 = vld.sshfl [vmem:[#allocation1 + $0x10] sm:$0xff pattern:$0x73625140] }
  0x28   :  { %v537_v28 = vld.sshfl [vmem:[#allocation1 + $0x18] sm:$0xff pattern:$0x73625140]  ;;  %v533_v29 = vld.sshfl [vmem:[#allocation1 + $0x8] sm:$0xff pattern:$0x73625140] }
  0x29   :  { %676 = vst [vmem:[#allocation1] ss:$4 sm:$0xff] %v3010_v25  ;;  %v539_v34 = vld.sshfl [vmem:[#allocation1 + $0x20] sm:$0xff pattern:$0x73625140] }
  0x2a   :  { %259 = vrot.lane.b32.xlu1 %v245_v15, %s2941_s25  ;;  %v541_v35 = vld.sshfl [vmem:[#allocation1 + $0x28] sm:$0xff pattern:$0x73625140]  ;;  %v543_v36 = vld.sshfl [vmem:[#allocation1 + $0x30] sm:$0xff pattern:$0x73625140] }
  0x2b   :  { %679 = vst [vmem:[#allocation1 + $0x20] ss:$4 sm:$0xff] %v674_v37 }
  0x2c   :  { %265 = vrot.lane.b32.xlu0 %v251_v11, %s2941_s25 }
  0x2d   :  { %400 = vrot.lane.b32.xlu2 %v386_v19, %s2942_s28 }
  0x30   :  { %v3018_v30 = vld.sshfl [vmem:[#allocation1] sm:$0xff pattern:$0x73625140]  ;;  %v3020_v31 = vld.sshfl [vmem:[#allocation1 + $0x8] sm:$0xff pattern:$0x73625140] }
  0x31   :  { %v3022_v32 = vld.sshfl [vmem:[#allocation1 + $0x10] sm:$0xff pattern:$0x73625140]  ;;  %v3024_v33 = vld.sshfl [vmem:[#allocation1 + $0x18] sm:$0xff pattern:$0x73625140] }
  0x32   :  { %404 = vrot.lane.b32.xlu1 %v390_v22, %s2942_s28  ;;  %790 = vst [vmem:[#allocation1] ss:$4 sm:$0xff] %v3010_v25  ;;  %v3040_v40 = vld.sshfl [vmem:[#allocation1 + $0x20] sm:$0xff pattern:$0x73625140] }
  0x33   :  { %v3042_v41 = vld.sshfl [vmem:[#allocation1 + $0x28] sm:$0xff pattern:$0x73625140] }
  0x34   :  { %402 = vrot.lane.b32.xlu0 %v388_v17, %s2942_s28  ;;  %793 = vst [vmem:[#allocation1 + $0x20] ss:$4 sm:$0xff] %v788_v38 }
  0x35   :  { %398 = vrot.lane.b32.xlu2 %v384_v18, %s2942_s28 }
  0x39   :  { %v794_v39 = vld.sshfl [vmem:[#allocation1] sm:$0xff pattern:$0x73625140]  ;;  %v796_v42 = vld.sshfl [vmem:[#allocation1 + $0x8] sm:$0xff pattern:$0x73625140] }
  0x3a   :  { %545 = vrot.lane.b32.xlu1 %v531_v26, %s2943_s6  ;;  %v798_v45 = vld.sshfl [vmem:[#allocation1 + $0x10] sm:$0xff pattern:$0x73625140]  ;;  %v800_v46 = vld.sshfl [vmem:[#allocation1 + $0x18] sm:$0xff pattern:$0x73625140] }
  0x3b   :  { %v802_v43 = vld.sshfl [vmem:[#allocation1 + $0x20] sm:$0xff pattern:$0x73625140]  ;;  %v804_v44 = vld.sshfl [vmem:[#allocation1 + $0x28] sm:$0xff pattern:$0x73625140] }
  0x3c   :  { %396 = vrot.lane.b32.xlu0 %v382_v20, %s2942_s28  ;;  %939 = vst [vmem:[#allocation1] ss:$4 sm:$0xff] %v3010_v25  ;;  %v806_v47 = vld.sshfl [vmem:[#allocation1 + $0x30] sm:$0xff pattern:$0x73625140] }
  0x3d   :  { %547 = vrot.lane.b32.xlu2 %v533_v29, %s2943_s6  ;;  %942 = vst [vmem:[#allocation1 + $0x20] ss:$4 sm:$0xff] %v937_v49 }
  0x42   :  { %406 = vrot.lane.b32.xlu1 %v392_v23, %s2942_s28 }
  0x43   :  { %v949_v50 = vld.sshfl [vmem:[#allocation1 + $0x18] sm:$0xff pattern:$0x73625140]  ;;  %v945_v51 = vld.sshfl [vmem:[#allocation1 + $0x8] sm:$0xff pattern:$0x73625140] }
  0x44   :  { %549 = vrot.lane.b32.xlu0 %v535_v27, %s2943_s6  ;;  %v947_v52 = vld.sshfl [vmem:[#allocation1 + $0x10] sm:$0xff pattern:$0x73625140]  ;;  %v951_v53 = vld.sshfl [vmem:[#allocation1 + $0x20] sm:$0xff pattern:$0x73625140] }
  0x45   :  { %408 = vrot.lane.b32.xlu2 %v394_v21, %s2942_s28  ;;  %v943_v54 = vld.sshfl [vmem:[#allocation1] sm:$0xff pattern:$0x73625140]  ;;  %v955_v60 = vld.sshfl [vmem:[#allocation1 + $0x30] sm:$0xff pattern:$0x73625140] }
  0x46   :  { %1088 = vst [vmem:[#allocation1] ss:$4 sm:$0xff] %v3010_v25  ;;  %v953_v63 = vld.sshfl [vmem:[#allocation1 + $0x28] sm:$0xff pattern:$0x73625140] }
  0x47   :  { %1091 = vst [vmem:[#allocation1 + $0x20] ss:$4 sm:$0xff] %v1086_v0 }
  0x4a   :  { %555 = vrot.lane.b32.xlu1 %v541_v35, %s2943_s6 }
  0x4c   :  { %553 = vrot.lane.b32.xlu0 %v539_v34, %s2943_s6 }
  0x4d   :  { %557 = vrot.lane.b32.xlu2 %v543_v36, %s2943_s6  ;;  %v1092_v56 = vld.sshfl [vmem:[#allocation1] sm:$0xff pattern:$0x73625140]  ;;  %v1094_v61 = vld.sshfl [vmem:[#allocation1 + $0x8] sm:$0xff pattern:$0x73625140] }
  0x4e   :  { %v1096_v62 = vld.sshfl [vmem:[#allocation1 + $0x10] sm:$0xff pattern:$0x73625140]  ;;  %v1100_v15 = vld.sshfl [vmem:[#allocation1 + $0x20] sm:$0xff pattern:$0x73625140] }
  0x4f   :  { %v1102_v16 = vld.sshfl [vmem:[#allocation1 + $0x28] sm:$0xff pattern:$0x73625140]  ;;  %v1098_v17 = vld.sshfl [vmem:[#allocation1 + $0x18] sm:$0xff pattern:$0x73625140] }
  0x50   :  { %1237 = vst [vmem:[#allocation1] ss:$4 sm:$0xff] %v3010_v25  ;;  %v1104_v26 = vld.sshfl [vmem:[#allocation1 + $0x30] sm:$0xff pattern:$0x73625140] }
  0x52   :  { %808 = vrot.lane.b32.xlu1 %v794_v39, %s2944_s11 }
  0x54   :  { %551 = vrot.lane.b32.xlu0 %v537_v28, %s2943_s6 }
  0x55   :  { %810 = vrot.lane.b32.xlu2 %v796_v42, %s2944_s11 }
  0x57   :  { %v1245_v25 = vld.sshfl [vmem:[#allocation1 + $0x10] sm:$0xff pattern:$0x73625140]  ;;  %v1241_v34 = vld.sshfl [vmem:[#allocation1] sm:$0xff pattern:$0x73625140] }
  0x58   :  { %v1247_v37 = vld.sshfl [vmem:[#allocation1 + $0x18] sm:$0xff pattern:$0x73625140]  ;;  %v1243_v42 = vld.sshfl [vmem:[#allocation1 + $0x8] sm:$0xff pattern:$0x73625140] }
  0x5a   :  { %816 = vrot.lane.b32.xlu1 %v802_v43, %s2944_s11  ;;  %v90_v43 = vld [vmem:[%s3789_s3] sm:$0xf] }
  0x5c   :  { %812 = vrot.lane.b32.xlu0 %v798_v45, %s2944_s11 }
  0x5d   :  { %818 = vrot.lane.b32.xlu2 %v804_v44, %s2944_s11  ;;  %v3116_v44 = vld [vmem:[%s3790_s1] sm:$0xff] }
  0x5e   :  { %1401 = vst [vmem:[#allocation1] ss:$4 sm:$0xff] %v3116_v44 }
  0x62   :  { %814 = vrot.lane.b32.xlu1 %v800_v46, %s2944_s11 }
  0x64   :  { %820 = vrot.lane.b32.xlu0 %v806_v47, %s2944_s11  ;;  %v1235_v47 = vld [vmem:[%s3788_s0 + $0xa] sm:$0x3f] }
  0x65   :  { %961 = vrot.lane.b32.xlu2 %v947_v52, %s2945_s14  ;;  %1240 = vst [vmem:[#allocation1 + $0x20] ss:$4 sm:$0xff] %v1235_v47 }
  0x67   :  { %v115_v48 = vpop.permute.xlu2 %114 }
  0x6a   :  { %965 = vrot.lane.b32.xlu1 %v951_v53, %s2945_s14 }
  0x6c   :  { %963 = vrot.lane.b32.xlu0 %v949_v50, %s2945_s14 }
  0x6d   :  { %959 = vrot.lane.b32.xlu2 %v945_v51, %s2945_s14 }
  0x6f   :  { %v254_v55 = vpop.permute.xlu2 %253 }
  0x72   :  { %1106 = vrot.lane.b32.xlu1 %v1092_v56, %s2946_s15  ;;  %v1407_v56 = vld.sshfl [vmem:[#allocation1 + $0x8] sm:$0xff pattern:$0x73625140] }
  0x74   :  { %957 = vrot.lane.b32.xlu0 %v943_v54, %s2945_s14 }
  0x75   :  { %1108 = vrot.lane.b32.xlu2 %v1094_v61, %s2946_s15  ;;  %v3140_v61 = vld.sshfl [vmem:[#allocation1 + $0x18] sm:$0xff pattern:$0x73625140] }
  0x77   :  { %v3063_v57 = vpop.permute.xlu2 %124 }
  0x7a   :  { %967 = vrot.lane.b32.xlu1 %v953_v63, %s2945_s14 }
  0x7c   :  { %v123_v58 = vpop.permute.xlu1 %122  ;;  %1110 = vrot.lane.b32.xlu0 %v1096_v62, %s2946_s15 }
  0x7d   :  { %v133_v6 = vsel %vm128_vm0, %v123_v58, %v3063_v57  ;;  %969 = vrot.lane.b32.xlu2 %v955_v60, %s2945_s14  ;;  %v1409_v60 = vld.sshfl [vmem:[#allocation1 + $0x10] sm:$0xff pattern:$0x73625140] }
  0x7e   :  { %v119_v59 = vpop.permute.xlu0 %118  ;;  %v153_v14 = vsel %vm139_vm1, %v133_v6, 0  ;;  %v1399_v6 = vld [vmem:[%s3790_s1 + $0x8] sm:$0x3f] }
  0x7f   :  { %v3071_v1 = vpop.permute.xlu2 %263 }
  0x82   :  { %1116 = vrot.lane.b32.xlu1 %v1102_v16, %s2946_s15 }
  0x84   :  { %v117_v2 = vpop.permute.xlu1 %116  ;;  %1114 = vrot.lane.b32.xlu0 %v1100_v15, %s2946_s15 }
  0x85   :  { %v129_v4 = vsel %vm128_vm0, %v115_v48, %v117_v2  ;;  %v130_v5 = vsel %vm128_vm0, %v117_v2, %v119_v59  ;;  %1118 = vrot.lane.b32.xlu2 %v1104_v26, %s2946_s15  ;;  %v1405_v2 = vld.sshfl [vmem:[#allocation1] sm:$0xff pattern:$0x73625140] }
  0x86   :  { %v121_v3 = vpop.permute.xlu0 %120  ;;  %v141_v7 = vsel %vm139_vm1, %v129_v4, 0  ;;  %v144_v8 = vsel %vm139_vm1, %v130_v5, 0  ;;  %1535 = vst [vmem:[#allocation1] ss:$4 sm:$0xff] %v3116_v44 }
  0x87   :  { %v131_v9 = vsel %vm128_vm0, %v119_v59, %v121_v3  ;;  %v132_v10 = vsel %vm128_vm0, %v121_v3, %v123_v58  ;;  %165 = vmatpush.bf16.msra.mxu0 %v141_v7  ;;  %178 = vmatpush.bf16.msra.mxu1 %v144_v8  ;;  %v3095_v20 = vpop.permute.xlu2 %400  ;;  %v1249_v58 = vld.sshfl [vmem:[#allocation1 + $0x20] sm:$0xff pattern:$0x73625140]  ;;  %v1253_v4 = vld.sshfl [vmem:[#allocation1 + $0x30] sm:$0xff pattern:$0x73625140] }
  0x88   :  { %v147_v11 = vsel %vm139_vm1, %v131_v9, 0  ;;  %v150_v12 = vsel %vm139_vm1, %v132_v10, 0  ;;  %v1251_v5 = vld.sshfl [vmem:[#allocation1 + $0x28] sm:$0xff pattern:$0x73625140] }
  0x89   :  { %191 = vmatpush.bf16.msra.mxu2 %v147_v11  ;;  %204 = vmatpush.bf16.msra.mxu3 %v150_v12  ;;  %1404 = vst [vmem:[#allocation1 + $0x20] ss:$4 sm:$0xff] %v1399_v6 }
  0x8a   :  { %2805 = vmatmul.msk.bf16.vlgmr.msra.gmra.mxu0 %vm135_vm2, %v2804_v13  ;;  %2806 = vmatmul.msk.bf16.vlgmr.msra.gmra.mxu1 %vm135_vm2, %v2804_v13 }
  0x8b   :  { %217 = vmatpush.bf16.msrb.mxu0 %v153_v14  ;;  %1259 = vrot.lane.b32.xlu1 %v1245_v25, %s2947_s20 }
  0x8c   :  { %2807 = vmatmul.msk.bf16.vlgmr.msra.gmra.mxu2 %vm135_vm2, %v2804_v13  ;;  %2808 = vmatmul.msk.bf16.vlgmr.msra.gmra.mxu3 %vm135_vm2, %v2804_v13  ;;  %v258_v18 = vpop.permute.xlu1 %257 }
  0x8d   :  { %1112 = vrot.lane.b32.xlu0 %v1098_v17, %s2946_s15  ;;  %1261 = vrot.lane.b32.xlu2 %v1247_v37, %s2947_s20  ;;  %v1540_v26 = vld.sshfl [vmem:[#allocation1 + $0x8] sm:$0xff pattern:$0x73625140] }
  0x8e   :  { %v256_v19 = vpop.permute.xlu0 %255 }
  0x8f   :  { %v268_v21 = vsel %vm267_vm3, %v254_v55, %v256_v19  ;;  %v269_v22 = vsel %vm267_vm3, %v256_v19, %v258_v18  ;;  %v399_v39 = vpop.permute.xlu2 %398 }
  0x90   :  { %v278_v23 = vsel %vm139_vm1, %v268_v21, 0  ;;  %v281_v24 = vsel %vm139_vm1, %v269_v22, 0  ;;  %v412_v45 = vsel %vm410_vm4, %v399_v39, %v3095_v20  ;;  %v3173_v22 = vld [vmem:[%s3789_s3 + $0x8] sm:$0xf] }
  0x91   :  { %302 = vmatpush.bf16.msrb.mxu2 %v278_v23  ;;  %315 = vmatpush.bf16.msrb.mxu3 %v281_v24  ;;  %v424_v51 = vsel %vm139_vm1, %v412_v45, 0  ;;  %v1544_v24 = vld.sshfl [vmem:[#allocation1 + $0x18] sm:$0xff pattern:$0x73625140] }
  0x93   :  { %1257 = vrot.lane.b32.xlu1 %v1243_v42, %s2947_s20  ;;  %v1413_v42 = vld.sshfl [vmem:[#allocation1 + $0x20] sm:$0xff pattern:$0x73625140] }
  0x94   :  { %v262_v27 = vpop.permute.xlu1 %261 }
  0x95   :  { %v272_v29 = vsel %vm267_vm3, %v262_v27, %v3071_v1  ;;  %1263 = vrot.lane.b32.xlu0 %v1249_v58, %s2947_s20  ;;  %1255 = vrot.lane.b32.xlu2 %v1241_v34, %s2947_s20 }
  0x96   :  { %v127_v28 = vpop.permute.xlu0 %126  ;;  %v290_v36 = vsel %vm139_vm1, %v272_v29, 0  ;;  %v1538_v29 = vld.sshfl [vmem:[#allocation1] sm:$0xff pattern:$0x73625140] }
  0x97   :  { %v134_v35 = vsel %vm128_vm0, %v3063_v57, %v127_v28  ;;  %354 = vmatpush.bf16.msra.mxu2 %v290_v36  ;;  %v548_v3 = vpop.permute.xlu2 %547 }
  0x98   :  { %v156_v38 = vsel %vm139_vm1, %v134_v35, 0 }
  0x99   :  { %230 = vmatpush.bf16.msrb.mxu1 %v156_v38 }
  0x9a   :  { %2809 = vmatmul.msk.bf16.vlgmr.msrb.gmra.mxu0 %vm135_vm2, %v2804_v13 }
  0x9b   :  { %1421 = vrot.lane.b32.xlu1 %v1407_v56, %s2940_s22  ;;  %v691_v56 = vsel %vm139_vm1, %v3020_v31, 0  ;;  %v1812_v31 = vld [vmem:[%s3790_s1 + $0x8] sm:$0x3f] }
  0x9c   :  { %2810 = vmatmul.msk.bf16.vlgmr.msrb.gmra.mxu1 %vm135_vm2, %v2804_v13  ;;  %2811 = vmatmul.msk.bf16.vlgmr.msrb.gmra.mxu2 %vm135_vm2, %v90_v43  ;;  %v260_v46 = vpop.permute.xlu1 %259  ;;  %v1417_v13 = vld.sshfl [vmem:[#allocation1 + $0x30] sm:$0xff pattern:$0x73625140] }
  0x9d   :  { %2812 = vmatmul.msk.bf16.vlgmr.msrb.gmra.mxu3 %vm135_vm2, %v90_v43  ;;  %v270_v48 = vsel %vm267_vm3, %v258_v18, %v260_v46  ;;  %v271_v49 = vsel %vm267_vm3, %v260_v46, %v262_v27  ;;  %1419 = vrot.lane.b32.xlu0 %v1405_v2, %s2940_s22  ;;  %v1542_v27 = vld.sshfl [vmem:[#allocation1 + $0x10] sm:$0xff pattern:$0x73625140] }
  0x9e   :  { %v266_v50 = vpop.permute.xlu0 %265  ;;  %v284_v52 = vsel %vm139_vm1, %v270_v48, 0  ;;  %v287_v53 = vsel %vm139_vm1, %v271_v49, 0  ;;  %1423 = vrot.lane.b32.xlu2 %v1409_v60, %s2940_s22  ;;  %1671 = vst [vmem:[#allocation1] ss:$4 sm:$0xff] %v3116_v44  ;;  %v2824_v49 = vld [vmem:[%s3789_s3 + $0xc] sm:$0xf] }
  0x9f   :  { %v273_v54 = vsel %vm267_vm3, %v3071_v1, %v266_v50  ;;  %328 = vmatpush.bf16.msra.mxu0 %v284_v52  ;;  %341 = vmatpush.bf16.msra.mxu1 %v287_v53  ;;  %v409_v14 = vpop.permute.xlu2 %408  ;;  %v693_v52 = vsel %vm139_vm1, %v3022_v32, 0 }
  0xa0   :  { %v293_v55 = vsel %vm139_vm1, %v273_v54, 0  ;;  %v1669_v54 = vld [vmem:[%s3790_s1 + $0x8] sm:$0x3f] }
  0xa1   :  { %367 = vmatpush.bf16.msra.mxu3 %v293_v55  ;;  %v695_v55 = vsel %vm139_vm1, %v3024_v33, 0 }
  0xa3   :  { %458 = vmatpush.bf16.msrb.mxu1 %v424_v51  ;;  %1267 = vrot.lane.b32.xlu1 %v1253_v4, %s2947_s20  ;;  %v697_v4 = vsel %vm139_vm1, %v3040_v40, 0  ;;  %v3246_v40 = vld [vmem:[%s3790_s1 + $0x2] sm:$0xff] }
  0xa4   :  { %v405_v57 = vpop.permute.xlu1 %404 }
  0xa5   :  { %1265 = vrot.lane.b32.xlu0 %v1251_v5, %s2947_s20  ;;  %v1679_v32 = vld.sshfl [vmem:[#allocation1 + $0x10] sm:$0xff pattern:$0x73625140]  ;;  %v1677_v2 = vld.sshfl [vmem:[#allocation1 + $0x8] sm:$0xff pattern:$0x73625140] }
  0xa6   :  { %v403_v59 = vpop.permute.xlu0 %402  ;;  %1427 = vrot.lane.b32.xlu2 %v1413_v42, %s2940_s22 }
  0xa7   :  { %v414_v62 = vsel %vm410_vm4, %v403_v59, %v405_v57  ;;  %v413_v63 = vsel %vm410_vm4, %v3095_v20, %v403_v59  ;;  %v558_v25 = vpop.permute.xlu2 %557 }
  0xa8   :  { %v430_v0 = vsel %vm139_vm1, %v414_v62, 0  ;;  %v427_v1 = vsel %vm139_vm1, %v413_v63, 0  ;;  %v1681_v62 = vld.sshfl [vmem:[#allocation1 + $0x18] sm:$0xff pattern:$0x73625140] }
  0xa9   :  { %471 = vmatpush.bf16.msrb.mxu2 %v427_v1  ;;  %484 = vmatpush.bf16.msrb.mxu3 %v430_v0 }
  0xaa   :  { %2813 = vmatmul.msk.bf16.vlgmr.msra.gmra.mxu0 %vm135_vm2, %v90_v43 }
  0xab   :  { %1431 = vrot.lane.b32.xlu1 %v1417_v13, %s2940_s22 }
  0xac   :  { %2814 = vmatmul.msk.bf16.vlgmr.msra.gmra.mxu1 %vm135_vm2, %v90_v43  ;;  %2815 = vmatmul.msk.bf16.vlgmr.msra.gmra.mxu2 %vm135_vm2, %v90_v43  ;;  %v546_v7 = vpop.permute.xlu1 %545 }
  0xad   :  { %2816 = vmatmul.msk.bf16.vlgmr.msra.gmra.mxu3 %vm135_vm2, %v90_v43  ;;  %v560_v9 = vsel %vm559_vm5, %v546_v7, %v548_v3  ;;  %v699_v7 = vsel %vm139_vm1, %v3042_v41, 0 }
  0xae   :  { %v397_v8 = vpop.permute.xlu0 %396  ;;  %v570_v11 = vsel %vm139_vm1, %v560_v9, 0  ;;  %1425 = vrot.lane.b32.xlu2 %v3140_v61, %s2940_s22 }
  0xaf   :  { %v411_v10 = vsel %vm410_vm4, %v397_v8, %v399_v39  ;;  %594 = vmatpush.bf16.msra.mxu2 %v570_v11  ;;  %v1415_v39 = vld.sshfl [vmem:[#allocation1 + $0x28] sm:$0xff pattern:$0x73625140]  ;;  %v811_v61 = vpop.permute.xlu2 %810 }
  0xb0   :  { %v421_v12 = vsel %vm139_vm1, %v411_v10, 0  ;;  %1429 = vrot.lane.b32.xlu0 %v1415_v39, %s2940_s22  ;;  %1537 = vst [vmem:[#allocation1 + $0x20] ss:$4 sm:$0xff] %v1399_v6 }
  0xb1   :  { %445 = vmatpush.bf16.msrb.mxu0 %v421_v12 }
  0xb3   :  { %1558 = vrot.lane.b32.xlu1 %v1544_v24, %s2941_s25 }
  0xb4   :  { %v407_v15 = vpop.permute.xlu1 %406 }
  0xb5   :  { %v415_v17 = vsel %vm410_vm4, %v405_v57, %v407_v15  ;;  %v416_v18 = vsel %vm410_vm4, %v407_v15, %v409_v14  ;;  %v689_v57 = vsel %vm139_vm1, %v3018_v30, 0  ;;  %v1955_v14 = vld [vmem:[%s3790_s1 + $0xa] sm:$0xf] }
  0xb6   :  { %v550_v16 = vpop.permute.xlu0 %549  ;;  %v433_v19 = vsel %vm139_vm1, %v415_v17, 0  ;;  %v436_v21 = vsel %vm139_vm1, %v416_v18, 0 }
  0xb7   :  { %v561_v20 = vsel %vm559_vm5, %v548_v3, %v550_v16  ;;  %497 = vmatpush.bf16.msra.mxu0 %v433_v19  ;;  %510 = vmatpush.bf16.msra.mxu1 %v436_v21  ;;  %v1546_v50 = vld.sshfl [vmem:[#allocation1 + $0x20] sm:$0xff pattern:$0x73625140]  ;;  %v1548_v51 = vld.sshfl [vmem:[#allocation1 + $0x28] sm:$0xff pattern:$0x73625140] }
  0xb8   :  { %v573_v23 = vsel %vm139_vm1, %v561_v20, 0  ;;  %v1550_v53 = vld.sshfl [vmem:[#allocation1 + $0x30] sm:$0xff pattern:$0x73625140]  ;;  %1556 = vrot.lane.b32.xlu0 %v1542_v27, %s2941_s25  ;;  %1560 = vrot.lane.b32.xlu2 %v1546_v50, %s2941_s25 }
  0xb9   :  { %607 = vmatpush.bf16.msra.mxu3 %v573_v23  ;;  %1674 = vst [vmem:[#allocation1 + $0x20] ss:$4 sm:$0xff] %v1669_v54  ;;  %v1675_v3 = vld.sshfl [vmem:[#allocation1] sm:$0xff pattern:$0x73625140] }
  0xba   :  { %2818 = vmatmul.msk.bf16.vlgmr.msrb.gmra.mxu0 %vm135_vm2, %v3173_v22  ;;  %1814 = vst [vmem:[#allocation1] ss:$4 sm:$0xff] %v3116_v44  ;;  %v819_v44 = vpop.permute.xlu2 %818  ;;  %v3267_v19 = vld [vmem:[%s3789_s3 + $0x10] sm:$0xf] }
  0xbb   :  { %1552 = vrot.lane.b32.xlu1 %v1538_v29, %s2941_s25 }
  0xbc   :  { %2819 = vmatmul.msk.bf16.vlgmr.msrb.gmra.mxu1 %vm135_vm2, %v3173_v22  ;;  %2820 = vmatmul.msk.bf16.vlgmr.msrb.gmra.mxu2 %vm135_vm2, %v3173_v22  ;;  %v556_v28 = vpop.permute.xlu1 %555 }
  0xbd   :  { %2821 = vmatmul.msk.bf16.vlgmr.msrb.gmra.mxu3 %vm135_vm2, %v3173_v22  ;;  %v565_v35 = vsel %vm559_vm5, %v556_v28, %v558_v25 }
  0xbe   :  { %v554_v34 = vpop.permute.xlu0 %553  ;;  %v585_v37 = vsel %vm139_vm1, %v565_v35, 0 }
  0xbf   :  { %v564_v36 = vsel %vm559_vm5, %v554_v34, %v556_v28  ;;  %659 = vmatpush.bf16.msrb.mxu3 %v585_v37  ;;  %v2064_v37 = vld [vmem:[%s3790_s1 + $0xa] sm:$0x3f] }
  0xc0   :  { %v582_v38 = vsel %vm139_vm1, %v564_v36, 0  ;;  %v1685_v33 = vld.sshfl [vmem:[#allocation1 + $0x28] sm:$0xff pattern:$0x73625140]  ;;  %1554 = vrot.lane.b32.xlu0 %v1540_v26, %s2941_s25  ;;  %1689 = vrot.lane.b32.xlu2 %v1675_v3, %s2942_s28 }
  0xc1   :  { %646 = vmatpush.bf16.msrb.mxu2 %v582_v38  ;;  %v1683_v59 = vld.sshfl [vmem:[#allocation1 + $0x20] sm:$0xff pattern:$0x73625140]  ;;  %v1687_v30 = vld.sshfl [vmem:[#allocation1 + $0x30] sm:$0xff pattern:$0x73625140] }
  0xc2   :  { %1817 = vst [vmem:[#allocation1 + $0x20] ss:$4 sm:$0xff] %v1812_v31  ;;  %v3248_v8 = vld.sshfl [vmem:[#allocation1] sm:$0xff pattern:$0x73625140]  ;;  %v962_v26 = vpop.permute.xlu2 %961 }
  0xc3   :  { %1693 = vrot.lane.b32.xlu1 %v1679_v32, %s2942_s28  ;;  %v3250_v9 = vld.sshfl [vmem:[#allocation1 + $0x8] sm:$0xff pattern:$0x73625140]  ;;  %v1822_v41 = vld.sshfl [vmem:[#allocation1 + $0x10] sm:$0xff pattern:$0x73625140] }
  0xc4   :  { %v809_v58 = vpop.permute.xlu1 %808  ;;  %v1824_v11 = vld.sshfl [vmem:[#allocation1 + $0x18] sm:$0xff pattern:$0x73625140] }
  0xc5   :  { %v823_v63 = vsel %vm822_vm6, %v809_v58, %v811_v61  ;;  %1957 = vst [vmem:[#allocation1] ss:$4 sm:$0xff] %v3246_v40 }
  0xc6   :  { %v552_v43 = vpop.permute.xlu0 %551  ;;  %v833_v5 = vsel %vm139_vm1, %v823_v63, 0 }
  0xc7   :  { %v562_v45 = vsel %vm559_vm5, %v550_v16, %v552_v43  ;;  %v563_v46 = vsel %vm559_vm5, %v552_v43, %v554_v34 }
  0xc8   :  { %v576_v47 = vsel %vm139_vm1, %v562_v45, 0  ;;  %v579_v48 = vsel %vm139_vm1, %v563_v46, 0  ;;  %1691 = vrot.lane.b32.xlu0 %v1677_v2, %s2942_s28  ;;  %1562 = vrot.lane.b32.xlu2 %v1548_v51, %s2941_s25 }
  0xc9   :  { %620 = vmatpush.bf16.msrb.mxu0 %v576_v47  ;;  %633 = vmatpush.bf16.msrb.mxu1 %v579_v48  ;;  %v1826_v13 = vld.sshfl [vmem:[#allocation1 + $0x20] sm:$0xff pattern:$0x73625140]  ;;  %v3260_v17 = vld.sshfl [vmem:[#allocation1 + $0x30] sm:$0xff pattern:$0x73625140] }
  0xca   :  { %2822 = vmatmul.msk.bf16.vlgmr.msra.gmra.mxu0 %vm135_vm2, %v3173_v22  ;;  %v1828_v20 = vld.sshfl [vmem:[#allocation1 + $0x28] sm:$0xff pattern:$0x73625140]  ;;  %v960_v43 = vpop.permute.xlu2 %959 }
  0xcb   :  { %1697 = vrot.lane.b32.xlu1 %v1683_v59, %s2942_s28  ;;  %1960 = vst [vmem:[#allocation1 + $0x20] ss:$4 sm:$0xff] %v1955_v14  ;;  %v2207_v47 = vld [vmem:[%s3790_s1 + $0xa] sm:$0x3f]  ;;  %v973_v48 = vsel %vm971_vm7, %v960_v43, %v962_v26 }
  0xcc   :  { %2823 = vmatmul.msk.bf16.vlgmr.msra.gmra.mxu1 %vm135_vm2, %v3173_v22  ;;  %2825 = vmatmul.msk.bf16.vlgmr.msra.gmra.mxu2 %vm135_vm2, %v2824_v49  ;;  %v817_v1 = vpop.permute.xlu1 %816  ;;  %v3273_v27 = vld.sshfl [vmem:[#allocation1] sm:$0xff pattern:$0x73625140]  ;;  %v3275_v28 = vld.sshfl [vmem:[#allocation1 + $0x8] sm:$0xff pattern:$0x73625140] }
  0xcd   :  { %2826 = vmatmul.msk.bf16.vlgmr.msra.gmra.mxu3 %vm135_vm2, %v2824_v49  ;;  %734 = vmatpush.bf16.msra.mxu2 %v693_v52  ;;  %v827_v18 = vsel %vm822_vm6, %v817_v1, %v819_v44  ;;  %v3281_v29 = vld.sshfl [vmem:[#allocation1 + $0x10] sm:$0xff pattern:$0x73625140]  ;;  %v3283_v34 = vld.sshfl [vmem:[#allocation1 + $0x18] sm:$0xff pattern:$0x73625140] }
  0xce   :  { %747 = vmatpush.bf16.msra.mxu3 %v695_v55  ;;  %721 = vmatpush.bf16.msra.mxu1 %v691_v56  ;;  %v813_v60 = vpop.permute.xlu0 %812  ;;  %v845_v25 = vsel %vm139_vm1, %v827_v18, 0  ;;  %2066 = vst [vmem:[#allocation1] ss:$4 sm:$0xff] %v3246_v40  ;;  %v3315_v55 = vld [vmem:[%s3789_s3 + $0x14] sm:$0xf]  ;;  %v985_v58 = vsel %vm139_vm1, %v973_v48, 0 }
  0xcf   :  { %708 = vmatpush.bf16.msra.mxu0 %v689_v57  ;;  %v824_v0 = vsel %vm822_vm6, %v811_v61, %v813_v60 }
  0xd0   :  { %v836_v6 = vsel %vm139_vm1, %v824_v0, 0  ;;  %1564 = vrot.lane.b32.xlu0 %v1550_v53, %s2941_s25  ;;  %1699 = vrot.lane.b32.xlu2 %v1685_v33, %s2942_s28  ;;  %v2350_v0 = vld [vmem:[%s3790_s1 + $0xa] sm:$0x3f] }
  0xd2   :  { %v3297_v39 = vld.sshfl [vmem:[#allocation1 + $0x20] sm:$0xff pattern:$0x73625140]  ;;  %v3299_v42 = vld.sshfl [vmem:[#allocation1 + $0x28] sm:$0xff pattern:$0x73625140] }
  0xd3   :  { %1695 = vrot.lane.b32.xlu1 %v1681_v62, %s2942_s28  ;;  %2069 = vst [vmem:[#allocation1 + $0x20] ss:$4 sm:$0xff] %v2064_v37 }
  0xd4   :  { %v815_v12 = vpop.permute.xlu1 %814 }
  0xd5   :  { %v825_v15 = vsel %vm822_vm6, %v813_v60, %v815_v12  ;;  %v826_v16 = vsel %vm822_vm6, %v815_v12, %v817_v1  ;;  %v2076_v45 = vld.sshfl [vmem:[#allocation1 + $0x18] sm:$0xff pattern:$0x73625140]  ;;  %v2074_v50 = vld.sshfl [vmem:[#allocation1 + $0x10] sm:$0xff pattern:$0x73625140]  ;;  %v1109_v60 = vpop.permute.xlu2 %1108 }
  0xd6   :  { %v821_v10 = vpop.permute.xlu0 %820  ;;  %v839_v21 = vsel %vm139_vm1, %v825_v15, 0  ;;  %v842_v23 = vsel %vm139_vm1, %v826_v16, 0  ;;  %v2070_v31 = vld.sshfl [vmem:[#allocation1] sm:$0xff pattern:$0x73625140] }
  0xd7   :  { %v828_v24 = vsel %vm822_vm6, %v819_v44, %v821_v10 }
  0xd8   :  { %1701 = vrot.lane.b32.xlu0 %v1687_v30, %s2942_s28  ;;  %v848_v35 = vsel %vm139_vm1, %v828_v24, 0  ;;  %1836 = vrot.lane.b32.xlu2 %v1822_v41, %s2943_s6 }
  0xda   :  { %2827 = vmatmul.msk.bf16.vlgmr.msrb.gmra.mxu0 %vm135_vm2, %v2824_v49  ;;  %v2078_v53 = vld.sshfl [vmem:[#allocation1 + $0x20] sm:$0xff pattern:$0x73625140]  ;;  %v3310_v54 = vld.sshfl [vmem:[#allocation1 + $0x28] sm:$0xff pattern:$0x73625140] }
  0xdb   :  { %760 = vmatpush.bf16.msrb.mxu0 %v697_v4  ;;  %1840 = vrot.lane.b32.xlu1 %v1826_v13, %s2943_s6  ;;  %v3317_v56 = vld.sshfl [vmem:[#allocation1 + $0x30] sm:$0xff pattern:$0x73625140] }
  0xdc   :  { %2828 = vmatmul.msk.bf16.vlgmr.msrb.gmra.mxu1 %vm135_vm2, %v2824_v49  ;;  %2829 = vmatmul.msk.bf16.vlgmr.msrb.gmra.mxu2 %vm135_vm2, %v2824_v49  ;;  %v966_v38 = vpop.permute.xlu1 %965  ;;  %2212 = vst [vmem:[#allocation1 + $0x20] ss:$4 sm:$0xff] %v2207_v47 }
  0xdd   :  { %2830 = vmatmul.msk.bf16.vlgmr.msrb.gmra.mxu3 %vm135_vm2, %v2824_v49  ;;  %857 = vmatpush.bf16.msrb.mxu2 %v833_v5  ;;  %v2072_v49 = vld.sshfl [vmem:[#allocation1 + $0x8] sm:$0xff pattern:$0x73625140]  ;;  %v970_v1 = vpop.permute.xlu2 %969 }
  0xde   :  { %870 = vmatpush.bf16.msrb.mxu3 %v836_v6  ;;  %773 = vmatpush.bf16.msrb.mxu1 %v699_v7  ;;  %v964_v36 = vpop.permute.xlu0 %963  ;;  %2209 = vst [vmem:[#allocation1] ss:$4 sm:$0xff] %v3246_v40 }
  0xdf   :  { %v975_v51 = vsel %vm971_vm7, %v964_v36, %v966_v38  ;;  %v974_v52 = vsel %vm971_vm7, %v962_v26, %v964_v36 }
  0xe0   :  { %1838 = vrot.lane.b32.xlu0 %v1824_v11, %s2943_s6  ;;  %1834 = vrot.lane.b32.xlu2 %v3250_v9, %s2943_s6  ;;  %v991_v33 = vsel %vm139_vm1, %v975_v51, 0  ;;  %v988_v59 = vsel %vm139_vm1, %v974_v52, 0 }
  0xe3   :  { %1842 = vrot.lane.b32.xlu1 %v1828_v20, %s2943_s6  ;;  %v3344_v2 = vld.sshfl [vmem:[#allocation1 + $0x28] sm:$0xff pattern:$0x73625140]  ;;  %v3346_v3 = vld.sshfl [vmem:[#allocation1 + $0x30] sm:$0xff pattern:$0x73625140] }
  0xe4   :  { %v1107_v57 = vpop.permute.xlu1 %1106  ;;  %v2221_v9 = vld.sshfl [vmem:[#allocation1 + $0x20] sm:$0xff pattern:$0x73625140] }
  0xe5   :  { %v2217_v63 = vld.sshfl [vmem:[#allocation1 + $0x10] sm:$0xff pattern:$0x73625140]  ;;  %v1121_v7 = vsel %vm1120_vm8, %v1107_v57, %v1109_v60  ;;  %2355 = vst [vmem:[#allocation1 + $0x20] ss:$4 sm:$0xff] %v2350_v0 }
  0xe6   :  { %v958_v46 = vpop.permute.xlu0 %957  ;;  %v1131_v11 = vsel %vm139_vm1, %v1121_v7, 0  ;;  %v2215_v18 = vld.sshfl [vmem:[#allocation1 + $0x8] sm:$0xff pattern:$0x73625140] }
  0xe7   :  { %v972_v32 = vsel %vm971_vm7, %v958_v46, %v960_v43  ;;  %v2219_v24 = vld.sshfl [vmem:[#allocation1 + $0x18] sm:$0xff pattern:$0x73625140] }
  0xe8   :  { %1832 = vrot.lane.b32.xlu0 %v3248_v8, %s2943_s6  ;;  %v982_v30 = vsel %vm139_vm1, %v972_v32, 0  ;;  %1844 = vrot.lane.b32.xlu2 %v3260_v17, %s2943_s6  ;;  %v2213_v17 = vld.sshfl [vmem:[#allocation1] sm:$0xff pattern:$0x73625140]  ;;  %v3387_v43 = vld [vmem:[%s3789_s3 + $0x18] sm:$0xf] }
  0xe9   :  { %2352 = vst [vmem:[#allocation1] ss:$4 sm:$0xff] %v3246_v40 }
  0xea   :  { %2832 = vmatmul.msk.bf16.vlgmr.msra.gmra.mxu0 %vm135_vm2, %v3267_v19 }
  0xeb   :  { %883 = vmatpush.bf16.msra.mxu0 %v839_v21  ;;  %2090 = vrot.lane.b32.xlu1 %v2076_v45, %s2944_s11 }
  0xec   :  { %2833 = vmatmul.msk.bf16.vlgmr.msra.gmra.mxu1 %vm135_vm2, %v3267_v19  ;;  %2834 = vmatmul.msk.bf16.vlgmr.msra.gmra.mxu2 %vm135_vm2, %v3267_v19  ;;  %v968_v62 = vpop.permute.xlu1 %967 }
  0xed   :  { %2835 = vmatmul.msk.bf16.vlgmr.msra.gmra.mxu3 %vm135_vm2, %v3267_v19  ;;  %896 = vmatpush.bf16.msra.mxu1 %v842_v23  ;;  %v976_v4 = vsel %vm971_vm7, %v966_v38, %v968_v62  ;;  %v977_v8 = vsel %vm971_vm7, %v968_v62, %v970_v1  ;;  %v1119_v23 = vpop.permute.xlu2 %1118  ;;  %v2493_v1 = vld [vmem:[%s3790_s1 + $0xa] sm:$0x3f] }
  0xee   :  { %909 = vmatpush.bf16.msra.mxu2 %v845_v25  ;;  %922 = vmatpush.bf16.msra.mxu3 %v848_v35  ;;  %v1111_v61 = vpop.permute.xlu0 %1110  ;;  %v994_v10 = vsel %vm139_vm1, %v976_v4, 0  ;;  %v997_v13 = vsel %vm139_vm1, %v977_v8, 0 }
  0xef   :  { %v1122_v44 = vsel %vm1120_vm8, %v1109_v60, %v1111_v61 }
  0xf0   :  { %2088 = vrot.lane.b32.xlu0 %v2074_v50, %s2944_s11  ;;  %2092 = vrot.lane.b32.xlu2 %v2078_v53, %s2944_s11  ;;  %v1134_v12 = vsel %vm139_vm1, %v1122_v44, 0  ;;  %v3395_v50 = vld.sshfl [vmem:[#allocation1 + $0x8] sm:$0xff pattern:$0x73625140] }
  0xf1   :  { %v2360_v52 = vld.sshfl [vmem:[#allocation1 + $0x10] sm:$0xff pattern:$0x73625140] }
  0xf3   :  { %2084 = vrot.lane.b32.xlu1 %v2070_v31, %s2944_s11 }
  0xf4   :  { %v1117_v14 = vpop.permute.xlu1 %1116 }
  0xf5   :  { %v1126_v48 = vsel %vm1120_vm8, %v1117_v14, %v1119_v23  ;;  %v1262_v57 = vpop.permute.xlu2 %1261 }
  0xf6   :  { %v1115_v41 = vpop.permute.xlu0 %1114 }
  0xf7   :  { %v1125_v38 = vsel %vm1120_vm8, %v1115_v41, %v1117_v14 }
  0xf8   :  { %2086 = vrot.lane.b32.xlu0 %v2072_v49, %s2944_s11  ;;  %2227 = vrot.lane.b32.xlu2 %v2213_v17, %s2945_s14  ;;  %v3393_v49 = vld.sshfl [vmem:[#allocation1] sm:$0xff pattern:$0x73625140]  ;;  %v1143_v53 = vsel %vm139_vm1, %v1125_v38, 0 }
  0xfa   :  { %2836 = vmatmul.msk.bf16.vlgmr.msrb.gmra.mxu0 %vm135_vm2, %v3267_v19 }
  0xfb   :  { %1006 = vmatpush.bf16.msrb.mxu0 %v982_v30  ;;  %2231 = vrot.lane.b32.xlu1 %v2217_v63, %s2945_s14 }
  0xfc   :  { %2837 = vmatmul.msk.bf16.vlgmr.msrb.gmra.mxu1 %vm135_vm2, %v3267_v19  ;;  %2839 = vmatmul.msk.bf16.vlgmr.msrb.gmra.mxu2 %vm135_vm2, %v3315_v55 }
  0xfd   :  { %2840 = vmatmul.msk.bf16.vlgmr.msrb.gmra.mxu3 %vm135_vm2, %v3315_v55  ;;  %1019 = vmatpush.bf16.msrb.mxu1 %v985_v58  ;;  %v1260_v47 = vpop.permute.xlu1 %1259  ;;  %v2362_v58 = vld.sshfl [vmem:[#allocation1 + $0x18] sm:$0xff pattern:$0x73625140]  ;;  %v1256_v0 = vpop.permute.xlu2 %1255 }
  0xfe   :  { %1032 = vmatpush.bf16.msrb.mxu2 %v988_v59  ;;  %1045 = vmatpush.bf16.msrb.mxu3 %v991_v33  ;;  %2495 = vst [vmem:[#allocation1] ss:$4 sm:$0xff] %v3246_v40  ;;  %v1272_v44 = vsel %vm1269_vm9, %v1260_v47, %v1262_v57 }
  0xff   :  { %v1113_v25 = vpop.permute.xlu0 %1112 }
 0x100   :  { %2229 = vrot.lane.b32.xlu0 %v2215_v18, %s2945_s14  ;;  %v1123_v36 = vsel %vm1120_vm8, %v1111_v61, %v1113_v25  ;;  %v1124_v45 = vsel %vm1120_vm8, %v1113_v25, %v1115_v41  ;;  %2094 = vrot.lane.b32.xlu2 %v3310_v54, %s2944_s11  ;;  %v2364_v54 = vld.sshfl [vmem:[#allocation1 + $0x20] sm:$0xff pattern:$0x73625140] }
 0x101   :  { %v1137_v51 = vsel %vm139_vm1, %v1123_v36, 0  ;;  %v1140_v32 = vsel %vm139_vm1, %v1124_v45, 0 }
 0x103   :  { %2235 = vrot.lane.b32.xlu1 %v2221_v9, %s2945_s14 }
 0x105   :  { %v1258_v62 = vpop.permute.xlu1 %1257  ;;  %v2499_v63 = vld.sshfl [vmem:[#allocation1] sm:$0xff pattern:$0x73625140] }
 0x106   :  { %v1270_v41 = vsel %vm1269_vm9, %v1256_v0, %v1258_v62 }
 0x107   :  { %v3350_v5 = vpop.f32.mrf.mxu0  ;;  %v3352_v6 = vpop.f32.mrf.mxu1 }
 0x108   :  { %2096 = vrot.lane.b32.xlu0 %v3317_v56, %s2944_s11  ;;  %v1146_v56 = vsel %vm139_vm1, %v1126_v48, 0  ;;  %v1264_v33 = vpop.permute.xlu0 %1263  ;;  %2237 = vrot.lane.b32.xlu2 %v3344_v2, %s2945_s14 }
 0x109   :  { %v1273_v2 = vsel %vm1269_vm9, %v1262_v57, %v1264_v33 }
 0x10a   :  { %2841 = vmatmul.msk.bf16.vlgmr.msra.gmra.mxu0 %vm135_vm2, %v3315_v55  ;;  %v1289_v17 = vsel %vm139_vm1, %v1273_v2, 0  ;;  %v3495_v2 = vld [vmem:[%s3789_s3 + $0x20] sm:$0xf] }
 0x10b   :  { %1058 = vmatpush.bf16.msra.mxu0 %v994_v10  ;;  %2233 = vrot.lane.b32.xlu1 %v2219_v24, %s2945_s14  ;;  %v3440_v10 = vld [vmem:[%s3789_s3 + $0x1c] sm:$0xf] }
 0x10c   :  { %2842 = vmatmul.msk.bf16.vlgmr.msra.gmra.mxu1 %vm135_vm2, %v3315_v55  ;;  %2843 = vmatmul.msk.bf16.vlgmr.msra.gmra.mxu2 %vm135_vm2, %v3315_v55 }
 0x10d   :  { %2844 = vmatmul.msk.bf16.vlgmr.msra.gmra.mxu3 %vm135_vm2, %v3315_v55  ;;  %1155 = vmatpush.bf16.msra.mxu2 %v1131_v11  ;;  %v2366_v11 = vld.sshfl [vmem:[#allocation1 + $0x28] sm:$0xff pattern:$0x73625140]  ;;  %v1422_v18 = vpop.permute.xlu1 %1421 }
 0x10e   :  { %1168 = vmatpush.bf16.msra.mxu3 %v1134_v12  ;;  %1071 = vmatpush.bf16.msra.mxu1 %v997_v13 }
 0x10f   :  { %v3371_v15 = vpop.f32.mrf.mxu2  ;;  %v3373_v16 = vpop.f32.mrf.mxu3 }
 0x110   :  { %v169_v20 = vpop.f32.mrf.mxu0  ;;  %v182_v21 = vpop.f32.mrf.mxu1  ;;  %2239 = vrot.lane.b32.xlu0 %v3346_v3, %s2945_s14  ;;  %2374 = vrot.lane.b32.xlu2 %v2360_v52, %s2946_s15 }
 0x111   :  { %v1420_v14 = vpop.permute.xlu0 %1419  ;;  %v1424_v21 = vpop.permute.xlu2 %1423 }
 0x112   :  { %v1433_v52 = vsel %vm128_vm0, %v1420_v14, %v1422_v18 }
 0x113   :  { %2378 = vrot.lane.b32.xlu1 %v2364_v54, %s2946_s15  ;;  %v1440_v54 = vsel %vm139_vm1, %v1433_v52, 0 }
 0x117   :  { %v195_v26 = vpop.f32.mrf.mxu2  ;;  %v208_v35 = vpop.f32.mrf.mxu3 }
 0x118   :  { %v3381_v37 = vpop.f32.mrf.mxu0  ;;  %2376 = vrot.lane.b32.xlu0 %v2362_v58, %s2946_s15  ;;  %2372 = vrot.lane.b32.xlu2 %v3395_v50, %s2946_s15  ;;  %v2948_v50 = vmov 0  }
 0x119   :  { %v3390_v46 = vpop.f32.mrf.mxu1  ;;  %v1266_v36 = vpop.permute.xlu0 %1265  ;;  %2932 = vset.pattern.permute.xlu1 %v2948_v50  ;;  %2933 = vset.pattern.permute.xlu0 %v2948_v50 }
 0x11a   :  { %2846 = vmatmul.msk.bf16.vlgmr.msrb.gmra.mxu0 %vm135_vm2, %v3387_v43  ;;  %v1274_v48 = vsel %vm1269_vm9, %v1264_v33, %v1266_v36 }
 0x11b   :  { %1181 = vmatpush.bf16.msrb.mxu0 %v1137_v51  ;;  %2513 = vrot.lane.b32.xlu1 %v2499_v63, %s2947_s20  ;;  %v1292_v58 = vsel %vm139_vm1, %v1274_v48, 0 }
 0x11c   :  { %2847 = vmatmul.msk.bf16.vlgmr.msrb.gmra.mxu1 %vm135_vm2, %v3387_v43  ;;  %2848 = vmatmul.msk.bf16.vlgmr.msrb.gmra.mxu2 %vm135_vm2, %v3387_v43 }
 0x11d   :  { %2849 = vmatmul.msk.bf16.vlgmr.msrb.gmra.mxu3 %vm135_vm2, %v3387_v43  ;;  %1194 = vmatpush.bf16.msrb.mxu1 %v1140_v32 }
 0x11e   :  { %1207 = vmatpush.bf16.msrb.mxu2 %v1143_v53  ;;  %1220 = vmatpush.bf16.msrb.mxu3 %v1146_v56  ;;  %v1428_v56 = vpop.permute.xlu2 %1427 }
 0x11f   :  { %v304_v31 = vpop.f32.mrf.mxu2 }
 0x120   :  { %v3416_v59 = vadd.f32 %v304_v31, %v3350_v5  ;;  %v317_v30 = vpop.f32.mrf.mxu3  ;;  %v221_v60 = vpop.f32.mrf.mxu0  ;;  %v3428_v5 = vld.sshfl [vmem:[#allocation1 + $0x30] sm:$0xff pattern:$0x73625140]  ;;  %2370 = vrot.lane.b32.xlu0 %v3393_v49, %s2946_s15 }
 0x121   :  { %v3419_v61 = vadd.f32 %v317_v30, %v3352_v6  ;;  %v234_v40 = vpop.f32.mrf.mxu1  ;;  %v1271_v6 = vsel %vm1269_vm9, %v1258_v62, %v1260_v47  ;;  %2498 = vst [vmem:[#allocation1 + $0x20] ss:$4 sm:$0xff] %v2493_v1  ;;  %v1268_v47 = vpop.permute.xlu1 %1267 }
 0x122   :  { %v1283_v13 = vsel %vm139_vm1, %v1271_v6, 0  ;;  %v1275_v32 = vsel %vm1269_vm9, %v1266_v36, %v1268_v47  ;;  %v1430_v60 = vpop.permute.xlu0 %1429 }
 0x123   :  { %2380 = vrot.lane.b32.xlu1 %v2366_v11, %s2946_s15  ;;  %v1295_v33 = vsel %vm139_vm1, %v1275_v32, 0 }
 0x127   :  { %v306_v4 = vpop.f32.mrf.mxu2 }
 0x128   :  { %v319_v7 = vpop.f32.mrf.mxu3  ;;  %v330_v3 = vpop.f32.mrf.mxu0  ;;  %v2509_v38 = vld.sshfl [vmem:[#allocation1 + $0x28] sm:$0xff pattern:$0x73625140] }
 0x129   :  { %v3435_v8 = vadd.f32 %v330_v3, %v3371_v15  ;;  %v343_v9 = vpop.f32.mrf.mxu1  ;;  %v1286_v15 = vsel %vm139_vm1, %v1272_v44, 0  ;;  %v1432_v1 = vpop.permute.xlu1 %1431 }
 0x12a   :  { %v3444_v12 = vadd.f32 %v343_v9, %v3373_v16  ;;  %2850 = vmatmul.msk.bf16.vlgmr.msra.gmra.mxu0 %vm135_vm2, %v3387_v43  ;;  %v1280_v16 = vsel %vm139_vm1, %v1270_v41, 0  ;;  %v1426_v4 = vpop.permute.xlu2 %1425 }
 0x12b   :  { %1304 = vmatpush.bf16.msra.mxu0 %v1280_v16  ;;  %2523 = vrot.lane.b32.xlu1 %v2509_v38, %s2947_s20  ;;  %v1435_v7 = vsel %vm128_vm0, %v1424_v21, %v1426_v4  ;;  %v1436_v9 = vsel %vm128_vm0, %v1426_v4, %v1428_v56 }
 0x12c   :  { %2851 = vmatmul.msk.bf16.vlgmr.msra.gmra.mxu1 %vm135_vm2, %v3387_v43  ;;  %2853 = vmatmul.msk.bf16.vlgmr.msra.gmra.mxu2 %vm135_vm2, %v3440_v10  ;;  %v1446_v14 = vsel %vm139_vm1, %v1435_v7, 0 }
 0x12d   :  { %2854 = vmatmul.msk.bf16.vlgmr.msra.gmra.mxu3 %vm135_vm2, %v3440_v10  ;;  %1317 = vmatpush.bf16.msra.mxu1 %v1283_v13 }
 0x12e   :  { %1330 = vmatpush.bf16.msra.mxu2 %v1286_v15  ;;  %1343 = vmatpush.bf16.msra.mxu3 %v1289_v17  ;;  %v1557_v15 = vpop.permute.xlu0 %1556  ;;  %v1449_v17 = vsel %vm139_vm1, %v1436_v9, 0 }
 0x12f   :  { %v356_v20 = vpop.f32.mrf.mxu2 }
 0x130   :  { %v357_v23 = vadd.f32 %v356_v20, %v3381_v37  ;;  %v369_v24 = vpop.f32.mrf.mxu3  ;;  %v332_v25 = vpop.f32.mrf.mxu0 }
 0x131   :  { %v370_v26 = vadd.f32 %v369_v24, %v3390_v46  ;;  %v345_v35 = vpop.f32.mrf.mxu1  ;;  %v1434_v46 = vsel %vm128_vm0, %v1422_v18, %v1424_v21  ;;  %v1559_v20 = vpop.permute.xlu1 %1558 }
 0x132   :  { %v1443_v31 = vsel %vm139_vm1, %v1434_v46, 0  ;;  %v1568_v46 = vsel %vm267_vm3, %v1557_v15, %v1559_v20 }
 0x136   :  { %v1555_v38 = vpop.permute.xlu0 %1554 }
 0x137   :  { %v358_v45 = vpop.f32.mrf.mxu2  ;;  %v1567_v48 = vsel %vm267_vm3, %v1555_v38, %v1557_v15 }
 0x138   :  { %v371_v37 = vpop.f32.mrf.mxu3  ;;  %v447_v51 = vpop.f32.mrf.mxu0 }
 0x139   :  { %v516_v53 = vadd.f32 %v447_v51, %v3416_v59  ;;  %v460_v49 = vpop.f32.mrf.mxu1  ;;  %v89_v59 = vld [vmem:[%s3791_s4] sm:$0xff]  ;;  %v1553_v45 = vpop.permute.xlu1 %1552 }
 0x13a   :  { %v517_v57 = vadd.f32 %v460_v49, %v3419_v61  ;;  %2855 = vmatmul.msk.bf16.vlgmr.msrb.gmra.mxu0 %vm135_vm2, %v3440_v10  ;;  %1383 = vperm.xlu1 %2932, %v89_v59   ;;  %v1566_v50 = vsel %vm267_vm3, %v1553_v45, %v1555_v38 }
 0x13b   :  { %1356 = vmatpush.bf16.msrb.mxu0 %v1292_v58 }
 0x13c   :  { %2856 = vmatmul.msk.bf16.vlgmr.msrb.gmra.mxu1 %vm135_vm2, %v3440_v10  ;;  %2857 = vmatmul.msk.bf16.vlgmr.msrb.gmra.mxu2 %vm135_vm2, %v3440_v10 }
 0x13d   :  { %2858 = vmatmul.msk.bf16.vlgmr.msrb.gmra.mxu3 %vm135_vm2, %v3440_v10  ;;  %1464 = vmatpush.bf16.msrb.mxu2 %v1440_v54  ;;  %v1579_v54 = vsel %vm139_vm1, %v1568_v46, 0 }
 0x13e   :  { %1477 = vmatpush.bf16.msrb.mxu3 %v1443_v31  ;;  %1369 = vmatpush.bf16.msrb.mxu1 %v1295_v33  ;;  %v2934_v31 = vld [vmem:[%s3789_s3 + $0x4] sm:$0xf]  ;;  %v1573_v33 = vsel %vm139_vm1, %v1566_v50, 0  ;;  %v1692_v59 = vpop.permute.xlu0 %1691 }
 0x13f   :  { %v473_v30 = vpop.f32.mrf.mxu2 }
 0x140   :  { %v518_v61 = vadd.f32 %v473_v30, %v3435_v8  ;;  %v486_v40 = vpop.f32.mrf.mxu3  ;;  %v449_v62 = vpop.f32.mrf.mxu0  ;;  %v1437_v8 = vsel %vm128_vm0, %v1428_v56, %v1430_v60 }
 0x141   :  { %v519_v63 = vadd.f32 %v486_v40, %v3444_v12  ;;  %v462_v0 = vpop.f32.mrf.mxu1  ;;  %v1438_v12 = vsel %vm128_vm0, %v1430_v60, %v1432_v1  ;;  %v1452_v16 = vsel %vm139_vm1, %v1437_v8, 0 }
 0x142   :  { %v1455_v18 = vsel %vm139_vm1, %v1438_v12, 0  ;;  %v1694_v0 = vpop.permute.xlu1 %1693 }
 0x143   :  { %v1704_v8 = vsel %vm410_vm4, %v1692_v59, %v1694_v0 }
 0x146   :  { %v1565_v4 = vpop.permute.xlu0 %1564 }
 0x147   :  { %v475_v6 = vpop.f32.mrf.mxu2 }
 0x148   :  { %v488_v3 = vpop.f32.mrf.mxu3  ;;  %v499_v44 = vpop.f32.mrf.mxu0 }
 0x149   :  { %v520_v41 = vadd.f32 %v499_v44, %v357_v23  ;;  %v512_v11 = vpop.f32.mrf.mxu1  ;;  %v1561_v23 = vpop.permute.xlu2 %1560 }
 0x14a   :  { %v521_v13 = vadd.f32 %v512_v11, %v370_v26  ;;  %2860 = vmatmul.msk.bf16.vlgmr.msra.gmra.mxu0 %vm135_vm2, %v3495_v2  ;;  %v1569_v52 = vsel %vm267_vm3, %v1559_v20, %v1561_v23 }
 0x14b   :  { %1490 = vmatpush.bf16.msra.mxu0 %v1446_v14  ;;  %v1582_v56 = vsel %vm139_vm1, %v1569_v52, 0 }
 0x14c   :  { %2861 = vmatmul.msk.bf16.vlgmr.msra.gmra.mxu1 %vm135_vm2, %v3495_v2  ;;  %2862 = vmatmul.msk.bf16.vlgmr.msra.gmra.mxu2 %vm135_vm2, %v3495_v2 }
 0x14d   :  { %2863 = vmatmul.msk.bf16.vlgmr.msra.gmra.mxu3 %vm135_vm2, %v3495_v2  ;;  %1503 = vmatpush.bf16.msra.mxu1 %v1449_v17  ;;  %v1713_v17 = vsel %vm139_vm1, %v1704_v8, 0 }
 0x14e   :  { %1516 = vmatpush.bf16.msra.mxu2 %v1452_v16  ;;  %1529 = vmatpush.bf16.msra.mxu3 %v1455_v18  ;;  %v1698_v16 = vpop.permute.xlu1 %1697  ;;  %v1702_v38 = vpop.permute.xlu0 %1701 }
 0x14f   :  { %v596_v21 = vpop.f32.mrf.mxu2 }
 0x150   :  { %v665_v24 = vadd.f32 %v596_v21, %v516_v53  ;;  %v609_v25 = vpop.f32.mrf.mxu3  ;;  %v501_v26 = vpop.f32.mrf.mxu0 }
 0x151   :  { %v666_v35 = vadd.f32 %v609_v25, %v517_v57  ;;  %v514_v36 = vpop.f32.mrf.mxu1  ;;  %v1690_v58 = vpop.permute.xlu2 %1689  ;;  %v1576_v57 = vsel %vm139_vm1, %v1567_v48, 0 }
 0x152   :  { %v1703_v9 = vsel %vm410_vm4, %v1690_v58, %v1692_v59  ;;  %v2503_v36 = vld.sshfl [vmem:[#allocation1 + $0x10] sm:$0xff pattern:$0x73625140] }
 0x153   :  { %v1710_v15 = vsel %vm139_vm1, %v1703_v9, 0  ;;  %2517 = vrot.lane.b32.xlu0 %v2503_v36, %s2947_s20 }
 0x156   :  { %v1696_v45 = vpop.permute.xlu1 %1695 }
 0x157   :  { %v598_v47 = vpop.f32.mrf.mxu2 }
 0x158   :  { %v611_v37 = vpop.f32.mrf.mxu3  ;;  %v622_v51 = vpop.f32.mrf.mxu0  ;;  %v1705_v47 = vsel %vm410_vm4, %v1694_v0, %v1696_v45 }
 0x159   :  { %v667_v49 = vadd.f32 %v622_v51, %v518_v61  ;;  %v635_v32 = vpop.f32.mrf.mxu1  ;;  %v1563_v1 = vpop.permute.xlu2 %1562  ;;  %v1706_v37 = vsel %vm410_vm4, %v1696_v45, %v1698_v16  ;;  %v1716_v58 = vsel %vm139_vm1, %v1705_v47, 0 }
 0x15a   :  { %v668_v53 = vadd.f32 %v635_v32, %v519_v63  ;;  %2864 = vmatmul.msk.bf16.vlgmr.msrb.gmra.mxu0 %vm135_vm2, %v3495_v2  ;;  %v1570_v7 = vsel %vm267_vm3, %v1561_v23, %v1563_v1  ;;  %v2507_v32 = vld.sshfl [vmem:[#allocation1 + $0x20] sm:$0xff pattern:$0x73625140] }
 0x15b   :  { %1597 = vmatpush.bf16.msrb.mxu0 %v1573_v33  ;;  %2521 = vrot.lane.b32.xlu0 %v2507_v32, %s2947_s20 }
 0x15c   :  { %2865 = vmatmul.msk.bf16.vlgmr.msrb.gmra.mxu1 %vm135_vm2, %v3495_v2  ;;  %2866 = vmatmul.msk.bf16.vlgmr.msrb.gmra.mxu2 %vm135_vm2, %v2934_v31 }
 0x15d   :  { %2867 = vmatmul.msk.bf16.vlgmr.msrb.gmra.mxu3 %vm135_vm2, %v2934_v31  ;;  %1610 = vmatpush.bf16.msrb.mxu1 %v1576_v57 }
 0x15e   :  { %1623 = vmatpush.bf16.msrb.mxu2 %v1579_v54  ;;  %1636 = vmatpush.bf16.msrb.mxu3 %v1582_v56  ;;  %v1719_v54 = vsel %vm139_vm1, %v1706_v37, 0 }
 0x15f   :  { %v648_v30 = vpop.f32.mrf.mxu2 }
 0x160   :  { %v669_v60 = vadd.f32 %v648_v30, %v520_v41  ;;  %v661_v61 = vpop.f32.mrf.mxu3  ;;  %v624_v40 = vpop.f32.mrf.mxu0  ;;  %v1571_v41 = vsel %vm267_vm3, %v1563_v1, %v1565_v4  ;;  %v2505_v1 = vld.sshfl [vmem:[#allocation1 + $0x18] sm:$0xff pattern:$0x73625140] }
 0x161   :  { %v670_v62 = vadd.f32 %v661_v61, %v521_v13  ;;  %v637_v63 = vpop.f32.mrf.mxu1  ;;  %v1585_v13 = vsel %vm139_vm1, %v1570_v7, 0  ;;  %v1588_v18 = vsel %vm139_vm1, %v1571_v41, 0  ;;  %v1700_v21 = vpop.permute.xlu2 %1699 }
 0x162   :  { %v1707_v46 = vsel %vm410_vm4, %v1698_v16, %v1700_v21  ;;  %v1839_v30 = vpop.permute.xlu0 %1838  ;;  %v1841_v7 = vpop.permute.xlu1 %1840 }
 0x163   :  { %v1722_v33 = vsel %vm139_vm1, %v1707_v46, 0  ;;  %2519 = vrot.lane.b32.xlu0 %v2505_v1, %s2947_s20  ;;  %v1849_v41 = vsel %vm559_vm5, %v1839_v30, %v1841_v7  ;;  %v2937_v1 = vld [vmem:[%s3789_s3 + $0xc] sm:$0xf] }
 0x167   :  { %v650_v6 = vpop.f32.mrf.mxu2 }
 0x168   :  { %v663_v3 = vpop.f32.mrf.mxu3  ;;  %v710_v44 = vpop.f32.mrf.mxu0 }
 0x169   :  { %v723_v11 = vpop.f32.mrf.mxu1  ;;  %v779_v12 = vadd.f32 %v710_v44, %v665_v24  ;;  %v1837_v56 = vpop.permute.xlu2 %1836 }
 0x16a   :  { %v780_v14 = vadd.f32 %v723_v11, %v666_v35  ;;  %2868 = vmatmul.msk.bf16.vlgmr.msra.gmra.mxu0 %vm135_vm2, %v2934_v31  ;;  %v1833_v6 = vpop.permute.xlu0 %1832  ;;  %v1848_v11 = vsel %vm559_vm5, %v1837_v56, %v1839_v30 }
 0x16b   :  { %1649 = vmatpush.bf16.msra.mxu0 %v1585_v13  ;;  %v1859_v16 = vsel %vm139_vm1, %v1848_v11, 0 }
 0x16c   :  { %2869 = vmatmul.msk.bf16.vlgmr.msra.gmra.mxu1 %vm135_vm2, %v2934_v31  ;;  %2870 = vmatmul.msk.bf16.vlgmr.msra.gmra.mxu2 %vm135_vm2, %v2934_v31 }
 0x16d   :  { %2871 = vmatmul.msk.bf16.vlgmr.msra.gmra.mxu3 %vm135_vm2, %v2934_v31  ;;  %1734 = vmatpush.bf16.msra.mxu2 %v1710_v15  ;;  %v2935_v31 = vld [vmem:[%s3789_s3] sm:$0xf] }
 0x16e   :  { %1747 = vmatpush.bf16.msra.mxu3 %v1713_v17  ;;  %1662 = vmatpush.bf16.msra.mxu1 %v1588_v18  ;;  %v1862_v18 = vsel %vm139_vm1, %v1849_v41, 0 }
 0x16f   :  { %v736_v20 = vpop.f32.mrf.mxu2 }
 0x170   :  { %v781_v23 = vadd.f32 %v736_v20, %v667_v49  ;;  %v749_v24 = vpop.f32.mrf.mxu3  ;;  %v712_v25 = vpop.f32.mrf.mxu0 }
 0x171   :  { %v782_v26 = vadd.f32 %v749_v24, %v668_v53  ;;  %v725_v35 = vpop.f32.mrf.mxu1  ;;  %v1708_v53 = vsel %vm410_vm4, %v1700_v21, %v1702_v38  ;;  %v1835_v4 = vpop.permute.xlu2 %1834  ;;  %v2936_v21 = vld [vmem:[%s3789_s3 + $0x8] sm:$0xf] }
 0x172   :  { %v1725_v59 = vsel %vm139_vm1, %v1708_v53, 0  ;;  %v1847_v44 = vsel %vm559_vm5, %v1835_v4, %v1837_v56  ;;  %v2501_v38 = vld.sshfl [vmem:[#allocation1 + $0x8] sm:$0xff pattern:$0x73625140]  ;;  %v1967_v53 = vsel %vm139_vm1, %v3273_v27, 0 }
 0x173   :  { %v1856_v17 = vsel %vm139_vm1, %v1847_v44, 0  ;;  %2515 = vrot.lane.b32.xlu2 %v2501_v38, %s2947_s20 }
 0x177   :  { %v738_v48 = vpop.f32.mrf.mxu2 }
 0x178   :  { %v751_v51 = vpop.f32.mrf.mxu3  ;;  %v762_v52 = vpop.f32.mrf.mxu0 }
 0x179   :  { %v783_v49 = vadd.f32 %v762_v52, %v669_v60  ;;  %v775_v50 = vpop.f32.mrf.mxu1  ;;  %v1845_v45 = vpop.permute.xlu2 %1844 }
 0x17a   :  { %v784_v57 = vadd.f32 %v775_v50, %v670_v62  ;;  %2872 = vmatmul.msk.bf16.vlgmr.msrb.gmra.mxu0 %vm135_vm2, %v2935_v31 }
 0x17b   :  { %1760 = vmatpush.bf16.msrb.mxu0 %v1716_v58  ;;  %2382 = vrot.lane.b32.xlu2 %v3428_v5, %s2946_s15  ;;  %v1969_v58 = vsel %vm139_vm1, %v3275_v28, 0 }
 0x17c   :  { %2873 = vmatmul.msk.bf16.vlgmr.msrb.gmra.mxu1 %vm135_vm2, %v2935_v31  ;;  %2874 = vmatmul.msk.bf16.vlgmr.msrb.gmra.mxu2 %vm135_vm2, %v2935_v31 }
 0x17d   :  { %2875 = vmatmul.msk.bf16.vlgmr.msrb.gmra.mxu3 %vm135_vm2, %v2935_v31  ;;  %1773 = vmatpush.bf16.msrb.mxu1 %v1719_v54 }
 0x17e   :  { %1786 = vmatpush.bf16.msrb.mxu2 %v1722_v33  ;;  %1799 = vmatpush.bf16.msrb.mxu3 %v1725_v59  ;;  %v2511_v59 = vld.sshfl [vmem:[#allocation1 + $0x30] sm:$0xff pattern:$0x73625140] }
 0x17f   :  { %v859_v60 = vpop.f32.mrf.mxu2 }
 0x180   :  { %v928_v61 = vadd.f32 %v859_v60, %v779_v12  ;;  %v872_v40 = vpop.f32.mrf.mxu3  ;;  %v764_v62 = vpop.f32.mrf.mxu0 }
 0x181   :  { %v929_v63 = vadd.f32 %v872_v40, %v780_v14  ;;  %v777_v0 = vpop.f32.mrf.mxu1  ;;  %v1846_v14 = vsel %vm559_vm5, %v1833_v6, %v1835_v4  ;;  %v1977_v4 = vsel %vm139_vm1, %v3299_v42, 0  ;;  %v1973_v6 = vsel %vm139_vm1, %v3283_v34, 0  ;;  %v2093_v44 = vpop.permute.xlu2 %2092 }
 0x182   :  { %v1853_v20 = vsel %vm139_vm1, %v1846_v14, 0  ;;  %v2089_v0 = vpop.permute.xlu0 %2088 }
 0x183   :  { %2525 = vrot.lane.b32.xlu2 %v2511_v59, %s2947_s20 }
 0x187   :  { %v861_v3 = vpop.f32.mrf.mxu2 }
 0x188   :  { %v874_v9 = vpop.f32.mrf.mxu3  ;;  %v885_v8 = vpop.f32.mrf.mxu0 }
 0x189   :  { %v930_v12 = vadd.f32 %v885_v8, %v781_v23  ;;  %v898_v13 = vpop.f32.mrf.mxu1 }
 0x18a   :  { %v931_v15 = vadd.f32 %v898_v13, %v782_v26  ;;  %2876 = vmatmul.msk.bf16.vlgmr.msra.gmra.mxu0 %vm135_vm2, %v2935_v31  ;;  %v2087_v41 = vpop.permute.xlu0 %2086 }
 0x18b   :  { %1877 = vmatpush.bf16.msra.mxu0 %v1853_v20  ;;  %v2099_v14 = vsel %vm822_vm6, %v2087_v41, %v2089_v0 }
 0x18c   :  { %2877 = vmatmul.msk.bf16.vlgmr.msra.gmra.mxu1 %vm135_vm2, %v2935_v31  ;;  %2878 = vmatmul.msk.bf16.vlgmr.msra.gmra.mxu2 %vm135_vm2, %v3173_v22  ;;  %v1843_v22 = vpop.permute.xlu1 %1842 }
 0x18d   :  { %2879 = vmatmul.msk.bf16.vlgmr.msra.gmra.mxu3 %vm135_vm2, %v2936_v21  ;;  %1890 = vmatpush.bf16.msra.mxu1 %v1856_v17  ;;  %v1850_v47 = vsel %vm559_vm5, %v1841_v7, %v1843_v22  ;;  %v1851_v32 = vsel %vm559_vm5, %v1843_v22, %v1845_v45 }
 0x18e   :  { %1903 = vmatpush.bf16.msra.mxu2 %v1859_v16  ;;  %1916 = vmatpush.bf16.msra.mxu3 %v1862_v18 }
 0x18f   :  { %v911_v23 = vpop.f32.mrf.mxu2 }
 0x190   :  { %v932_v24 = vadd.f32 %v911_v23, %v783_v49  ;;  %v924_v25 = vpop.f32.mrf.mxu3  ;;  %v887_v26 = vpop.f32.mrf.mxu0  ;;  %v1865_v49 = vsel %vm139_vm1, %v1850_v47, 0 }
 0x191   :  { %v933_v35 = vadd.f32 %v924_v25, %v784_v57  ;;  %v900_v36 = vpop.f32.mrf.mxu1  ;;  %v1868_v57 = vsel %vm139_vm1, %v1851_v32, 0  ;;  %v2108_v25 = vsel %vm139_vm1, %v2099_v14, 0 }
 0x192   :  { %v2230_v38 = vpop.permute.xlu0 %2229 }
 0x194   :  { %v2091_v7 = vpop.permute.xlu1 %2090 }
 0x195   :  { %v2101_v17 = vsel %vm822_vm6, %v2091_v7, %v2093_v44  ;;  %v2100_v16 = vsel %vm822_vm6, %v2089_v0, %v2091_v7 }
 0x196   :  { %v2114_v26 = vsel %vm139_vm1, %v2101_v17, 0 }
 0x197   :  { %v913_v48 = vpop.f32.mrf.mxu2 }
 0x198   :  { %v926_v37 = vpop.f32.mrf.mxu3  ;;  %v1008_v51 = vpop.f32.mrf.mxu0 }
 0x199   :  { %v1077_v52 = vadd.f32 %v1008_v51, %v928_v61  ;;  %v1021_v46 = vpop.f32.mrf.mxu1 }
 0x19a   :  { %v1078_v50 = vadd.f32 %v1021_v46, %v929_v63  ;;  %2880 = vmatmul.msk.bf16.vlgmr.msrb.gmra.mxu0 %vm135_vm2, %v2936_v21  ;;  %v1975_v63 = vsel %vm139_vm1, %v3297_v39, 0  ;;  %v1971_v39 = vsel %vm139_vm1, %v3281_v29, 0  ;;  %v2097_v32 = vpop.permute.xlu0 %2096 }
 0x19b   :  { %1929 = vmatpush.bf16.msrb.mxu0 %v1865_v49 }
 0x19c   :  { %2881 = vmatmul.msk.bf16.vlgmr.msrb.gmra.mxu1 %vm135_vm2, %v2936_v21  ;;  %2882 = vmatmul.msk.bf16.vlgmr.msrb.gmra.mxu2 %vm135_vm2, %v2936_v21 }
 0x19d   :  { %2883 = vmatmul.msk.bf16.vlgmr.msrb.gmra.mxu3 %vm135_vm2, %v2936_v21  ;;  %1986 = vmatpush.bf16.msrb.mxu2 %v1967_v53 }
 0x19e   :  { %1999 = vmatpush.bf16.msrb.mxu3 %v1969_v58  ;;  %1942 = vmatpush.bf16.msrb.mxu1 %v1868_v57 }
 0x19f   :  { %v1034_v5 = vpop.f32.mrf.mxu2 }
 0x1a0   :  { %v1079_v56 = vadd.f32 %v1034_v5, %v930_v12  ;;  %v1047_v54 = vpop.f32.mrf.mxu3  ;;  %v1010_v31 = vpop.f32.mrf.mxu0 }
 0x1a1   :  { %v1080_v27 = vadd.f32 %v1047_v54, %v931_v15  ;;  %v1023_v33 = vpop.f32.mrf.mxu1  ;;  %v2085_v12 = vpop.permute.xlu1 %2084 }
 0x1a2   :  { %v2098_v21 = vsel %vm822_vm6, %v2085_v12, %v2087_v41  ;;  %v2938_v33 = vld [vmem:[%s3789_s3 + $0x10] sm:$0xf] }
 0x1a3   :  { %v2105_v36 = vsel %vm139_vm1, %v2098_v21, 0 }
 0x1a7   :  { %v1036_v28 = vpop.f32.mrf.mxu2 }
 0x1a8   :  { %v1049_v30 = vpop.f32.mrf.mxu3  ;;  %v1060_v60 = vpop.f32.mrf.mxu0 }
 0x1a9   :  { %v1081_v61 = vadd.f32 %v1060_v60, %v932_v24  ;;  %v1073_v40 = vpop.f32.mrf.mxu1  ;;  %v2228_v24 = vpop.permute.xlu2 %2227 }
 0x1aa   :  { %v1082_v62 = vadd.f32 %v1073_v40, %v933_v35  ;;  %2884 = vmatmul.msk.bf16.vlgmr.msra.gmra.mxu0 %vm135_vm2, %v2937_v1  ;;  %v2111_v35 = vsel %vm139_vm1, %v2100_v16, 0 }
 0x1ab   :  { %2012 = vmatpush.bf16.msra.mxu0 %v1971_v39 }
 0x1ac   :  { %2885 = vmatmul.msk.bf16.vlgmr.msra.gmra.mxu1 %vm135_vm2, %v2937_v1  ;;  %2886 = vmatmul.msk.bf16.vlgmr.msra.gmra.mxu2 %vm135_vm2, %v2937_v1 }
 0x1ad   :  { %2887 = vmatmul.msk.bf16.vlgmr.msra.gmra.mxu3 %vm135_vm2, %v2937_v1  ;;  %2038 = vmatpush.bf16.msra.mxu2 %v1975_v63 }
 0x1ae   :  { %2051 = vmatpush.bf16.msra.mxu3 %v1977_v4  ;;  %2025 = vmatpush.bf16.msra.mxu1 %v1973_v6  ;;  %v2240_v6 = vpop.permute.xlu0 %2239 }
 0x1af   :  { %v1157_v3 = vpop.f32.mrf.mxu2 }
 0x1b0   :  { %v1226_v42 = vadd.f32 %v1157_v3, %v1077_v52  ;;  %v1170_v9 = vpop.f32.mrf.mxu3  ;;  %v1062_v8 = vpop.f32.mrf.mxu0 }
 0x1b1   :  { %v1227_v34 = vadd.f32 %v1170_v9, %v1078_v50  ;;  %v1075_v11 = vpop.f32.mrf.mxu1  ;;  %v2232_v52 = vpop.permute.xlu1 %2231 }
 0x1b2   :  { %v2095_v46 = vpop.permute.xlu2 %2094  ;;  %v2242_v57 = vsel %vm971_vm7, %v2230_v38, %v2232_v52 }
 0x1b3   :  { %v2102_v50 = vsel %vm822_vm6, %v2093_v44, %v2095_v46  ;;  %v2103_v54 = vsel %vm822_vm6, %v2095_v46, %v2097_v32  ;;  %v2251_v28 = vsel %vm139_vm1, %v2242_v57, 0 }
 0x1b4   :  { %v2120_v60 = vsel %vm139_vm1, %v2103_v54, 0 }
 0x1b6   :  { %v2377_v17 = vpop.permute.xlu0 %2376 }
 0x1b7   :  { %v1159_v13 = vpop.f32.mrf.mxu2 }
 0x1b8   :  { %v1172_v29 = vpop.f32.mrf.mxu3  ;;  %v1183_v15 = vpop.f32.mrf.mxu0 }
 0x1b9   :  { %v1228_v18 = vadd.f32 %v1183_v15, %v1079_v56  ;;  %v1196_v20 = vpop.f32.mrf.mxu1  ;;  %v2236_v30 = vpop.permute.xlu1 %2235 }
 0x1ba   :  { %v1229_v23 = vadd.f32 %v1196_v20, %v1080_v27  ;;  %2888 = vmatmul.msk.bf16.vlgmr.msrb.gmra.mxu0 %vm135_vm2, %v2937_v1  ;;  %v2117_v27 = vsel %vm139_vm1, %v2102_v50, 0  ;;  %v2238_v40 = vpop.permute.xlu2 %2237 }
 0x1bb   :  { %2129 = vmatpush.bf16.msrb.mxu0 %v2105_v36  ;;  %v2245_v8 = vsel %vm971_vm7, %v2236_v30, %v2238_v40  ;;  %v2246_v41 = vsel %vm971_vm7, %v2238_v40, %v2240_v6 }
 0x1bc   :  { %2889 = vmatmul.msk.bf16.vlgmr.msrb.gmra.mxu1 %vm135_vm2, %v2937_v1  ;;  %2890 = vmatmul.msk.bf16.vlgmr.msrb.gmra.mxu2 %vm135_vm2, %v3267_v19  ;;  %v2260_v15 = vsel %vm139_vm1, %v2245_v8, 0  ;;  %v2263_v16 = vsel %vm139_vm1, %v2246_v41, 0 }
 0x1bd   :  { %2891 = vmatmul.msk.bf16.vlgmr.msrb.gmra.mxu3 %vm135_vm2, %v3267_v19  ;;  %2142 = vmatpush.bf16.msrb.mxu1 %v2108_v25  ;;  %v2241_v19 = vsel %vm971_vm7, %v2228_v24, %v2230_v38 }
 0x1be   :  { %2155 = vmatpush.bf16.msrb.mxu2 %v2111_v35  ;;  %2168 = vmatpush.bf16.msrb.mxu3 %v2114_v26  ;;  %v2248_v59 = vsel %vm139_vm1, %v2241_v19, 0  ;;  %v2371_v35 = vpop.permute.xlu0 %2370 }
 0x1bf   :  { %v1209_v22 = vpop.f32.mrf.mxu2 }
 0x1c0   :  { %v1230_v45 = vadd.f32 %v1209_v22, %v1081_v61  ;;  %v1222_v47 = vpop.f32.mrf.mxu3  ;;  %v1185_v48 = vpop.f32.mrf.mxu0 }
 0x1c1   :  { %v1231_v37 = vadd.f32 %v1222_v47, %v1082_v62  ;;  %v1198_v51 = vpop.f32.mrf.mxu1  ;;  %v2234_v39 = vpop.permute.xlu1 %2233 }
 0x1c2   :  { %v2243_v7 = vsel %vm971_vm7, %v2232_v52, %v2234_v39  ;;  %v2244_v44 = vsel %vm971_vm7, %v2234_v39, %v2236_v30  ;;  %v2375_v14 = vpop.permute.xlu2 %2374 }
 0x1c3   :  { %v2254_v12 = vsel %vm139_vm1, %v2243_v7, 0  ;;  %v2257_v29 = vsel %vm139_vm1, %v2244_v44, 0  ;;  %v2386_v47 = vsel %vm1120_vm8, %v2375_v14, %v2377_v17 }
 0x1c4   :  { %v2397_v46 = vsel %vm139_vm1, %v2386_v47, 0 }
 0x1c7   :  { %v1211_v49 = vpop.f32.mrf.mxu2 }
 0x1c8   :  { %v1224_v53 = vpop.f32.mrf.mxu3  ;;  %v1306_v58 = vpop.f32.mrf.mxu0 }
 0x1c9   :  { %v1319_v5 = vpop.f32.mrf.mxu1  ;;  %v3623_v56 = vadd.f32 %v1306_v58, %v1226_v42  ;;  %v2379_v25 = vpop.permute.xlu1 %2378 }
 0x1ca   :  { %v3626_v31 = vadd.f32 %v1319_v5, %v1227_v34  ;;  %2892 = vmatmul.msk.bf16.vlgmr.msra.gmra.mxu0 %vm135_vm2, %v2938_v33  ;;  %v2373_v26 = vpop.permute.xlu2 %2372  ;;  %v2518_v58 = vpop.permute.xlu0 %2517 }
 0x1cb   :  { %2181 = vmatpush.bf16.msra.mxu0 %v2117_v27  ;;  %v2385_v36 = vsel %vm1120_vm8, %v2373_v26, %v2375_v14 }
 0x1cc   :  { %2893 = vmatmul.msk.bf16.vlgmr.msra.gmra.mxu1 %vm135_vm2, %v2938_v33  ;;  %2894 = vmatmul.msk.bf16.vlgmr.msra.gmra.mxu2 %vm135_vm2, %v2938_v33  ;;  %v2394_v51 = vsel %vm139_vm1, %v2385_v36, 0 }
 0x1cd   :  { %2895 = vmatmul.msk.bf16.vlgmr.msra.gmra.mxu3 %vm135_vm2, %v2938_v33  ;;  %2272 = vmatpush.bf16.msra.mxu2 %v2248_v59 }
 0x1ce   :  { %2285 = vmatpush.bf16.msra.mxu3 %v2251_v28  ;;  %2194 = vmatpush.bf16.msra.mxu1 %v2120_v60 }
 0x1cf   :  { %v1332_v61 = vpop.f32.mrf.mxu2 }
 0x1d0   :  { %v3639_v62 = vadd.f32 %v1332_v61, %v1228_v18  ;;  %v1345_v63 = vpop.f32.mrf.mxu3  ;;  %v1308_v0 = vpop.f32.mrf.mxu0  ;;  %v2939_v18 = vld [vmem:[%s3789_s3 + $0x14] sm:$0xf] }
 0x1d1   :  { %v3641_v1 = vadd.f32 %v1345_v63, %v1229_v23  ;;  %v1321_v4 = vpop.f32.mrf.mxu1  ;;  %v2514_v32 = vpop.permute.xlu1 %2513 }
 0x1d2   :  { %v2516_v50 = vpop.permute.xlu2 %2515  ;;  %v2522_v39 = vpop.permute.xlu0 %2521 }
 0x1d3   :  { %v2527_v60 = vsel %vm1269_vm9, %v2514_v32, %v2516_v50  ;;  %v2528_v61 = vsel %vm1269_vm9, %v2516_v50, %v2518_v58 }
 0x1d4   :  { %v2534_v7 = vsel %vm139_vm1, %v2527_v60, 0 }
 0x1d7   :  { %v1334_v3 = vpop.f32.mrf.mxu2 }
 0x1d8   :  { %v1347_v42 = vpop.f32.mrf.mxu3  ;;  %v1358_v9 = vpop.f32.mrf.mxu0  ;;  %v2537_v3 = vsel %vm139_vm1, %v2528_v61, 0 }
 0x1d9   :  { %v1371_v34 = vpop.f32.mrf.mxu1  ;;  %v3646_v11 = vadd.f32 %v1358_v9, %v1230_v45  ;;  %v2387_v45 = vsel %vm1120_vm8, %v2377_v17, %v2379_v25  ;;  %v2381_v54 = vpop.permute.xlu1 %2380 }
 0x1da   :  { %v3650_v13 = vadd.f32 %v1371_v34, %v1231_v37  ;;  %2896 = vmatmul.msk.bf16.vlgmr.msrb.gmra.mxu0 %vm135_vm2, %v3315_v55  ;;  %v2384_v37 = vsel %vm1120_vm8, %v2371_v35, %v2373_v26  ;;  %v2400_v52 = vsel %vm139_vm1, %v2387_v45, 0  ;;  %v2383_v27 = vpop.permute.xlu2 %2382  ;;  %v2388_v33 = vsel %vm1120_vm8, %v2379_v25, %v2381_v54  ;;  %v2520_v14 = vpop.permute.xlu0 %2519 }
 0x1db   :  { %2298 = vmatpush.bf16.msrb.mxu0 %v2254_v12  ;;  %v2391_v49 = vsel %vm139_vm1, %v2384_v37, 0  ;;  %v2389_v0 = vsel %vm1120_vm8, %v2381_v54, %v2383_v27  ;;  %v2403_v4 = vsel %vm139_vm1, %v2388_v33, 0 }
 0x1dc   :  { %2897 = vmatmul.msk.bf16.vlgmr.msrb.gmra.mxu1 %vm135_vm2, %v3315_v55  ;;  %2898 = vmatmul.msk.bf16.vlgmr.msrb.gmra.mxu2 %vm135_vm2, %v3315_v55  ;;  %v2406_v44 = vsel %vm139_vm1, %v2389_v0, 0 }
 0x1dd   :  { %2899 = vmatmul.msk.bf16.vlgmr.msrb.gmra.mxu3 %vm135_vm2, %v2939_v18  ;;  %2311 = vmatpush.bf16.msrb.mxu1 %v2257_v29 }
 0x1de   :  { %2324 = vmatpush.bf16.msrb.mxu2 %v2260_v15  ;;  %2337 = vmatpush.bf16.msrb.mxu3 %v2263_v16  ;;  %v2529_v16 = vsel %vm1269_vm9, %v2518_v58, %v2520_v14 }
 0x1df   :  { %v1466_v20 = vpop.f32.mrf.mxu2  ;;  %v2540_v35 = vsel %vm139_vm1, %v2529_v16, 0 }
 0x1e0   :  { %v1479_v21 = vpop.f32.mrf.mxu3  ;;  %v1360_v23 = vpop.f32.mrf.mxu0 }
 0x1e1   :  { %v1373_v24 = vpop.f32.mrf.mxu1  ;;  %v2524_v15 = vpop.permute.xlu1 %2523 }
 0x1e2   :  { %v2526_v29 = vpop.permute.xlu2 %2525 }
 0x1e3   :  { %v2532_v25 = vsel %vm1269_vm9, %v2524_v15, %v2526_v29 }
 0x1e7   :  { %v1468_v55 = vpop.f32.mrf.mxu2 }
 0x1e8   :  { %v1481_v38 = vpop.f32.mrf.mxu3  ;;  %v1492_v22 = vpop.f32.mrf.mxu0 }
 0x1e9   :  { %v1505_v48 = vpop.f32.mrf.mxu1  ;;  %v2549_v38 = vsel %vm139_vm1, %v2532_v25, 0 }
 0x1ea   :  { %2900 = vmatmul.msk.bf16.vlgmr.msra.gmra.mxu0 %vm135_vm2, %v2939_v18 }
 0x1eb   :  { %2415 = vmatpush.bf16.msra.mxu0 %v2391_v49 }
 0x1ec   :  { %2901 = vmatmul.msk.bf16.vlgmr.msra.gmra.mxu1 %vm135_vm2, %v2939_v18  ;;  %2902 = vmatmul.msk.bf16.vlgmr.msra.gmra.mxu2 %vm135_vm2, %v3387_v43 }
 0x1ed   :  { %2903 = vmatmul.msk.bf16.vlgmr.msra.gmra.mxu3 %vm135_vm2, %v3387_v43  ;;  %2428 = vmatpush.bf16.msra.mxu1 %v2394_v51 }
 0x1ee   :  { %2441 = vmatpush.bf16.msra.mxu2 %v2397_v46  ;;  %2454 = vmatpush.bf16.msra.mxu3 %v2400_v52 }
 0x1ef   :  { %v1518_v53 = vpop.f32.mrf.mxu2 }
 0x1f0   :  { %v1531_v19 = vpop.f32.mrf.mxu3  ;;  %v1494_v57 = vpop.f32.mrf.mxu0 }
 0x1f1   :  { %v1507_v5 = vpop.f32.mrf.mxu1 }
 0x1f7   :  { %v1520_v59 = vpop.f32.mrf.mxu2 }
 0x1f8   :  { %v1533_v28 = vpop.f32.mrf.mxu3  ;;  %v1599_v30 = vpop.f32.mrf.mxu0 }
 0x1f9   :  { %v1612_v40 = vpop.f32.mrf.mxu1  ;;  %v1600_v63 = vadd.f32 %v1599_v30, %v1466_v20  ;;  %v2531_v20 = vsel %vm1269_vm9, %v2522_v39, %v2524_v15 }
 0x1fa   :  { %v1613_v6 = vadd.f32 %v1612_v40, %v1479_v21  ;;  %2904 = vmatmul.msk.bf16.vlgmr.msrb.gmra.mxu0 %vm135_vm2, %v3387_v43  ;;  %v2530_v21 = vsel %vm1269_vm9, %v2520_v14, %v2522_v39  ;;  %v2546_v55 = vsel %vm139_vm1, %v2531_v20, 0 }
 0x1fb   :  { %2467 = vmatpush.bf16.msrb.mxu0 %v2403_v4  ;;  %v2543_v36 = vsel %vm139_vm1, %v2530_v21, 0 }
 0x1fc   :  { %2905 = vmatmul.msk.bf16.vlgmr.msrb.gmra.mxu1 %vm135_vm2, %v3387_v43  ;;  %2906 = vmatmul.msk.bf16.vlgmr.msrb.gmra.mxu2 %vm135_vm2, %v3387_v43 }
 0x1fd   :  { %2907 = vmatmul.msk.bf16.vlgmr.msrb.gmra.mxu3 %vm135_vm2, %v3387_v43  ;;  %2558 = vmatpush.bf16.msrb.mxu2 %v2534_v7 }
 0x1fe   :  { %2571 = vmatpush.bf16.msrb.mxu3 %v2537_v3  ;;  %2480 = vmatpush.bf16.msrb.mxu1 %v2406_v44 }
 0x1ff   :  { %v1625_v42 = vpop.f32.mrf.mxu2 }
 0x200   :  { %v1626_v9 = vadd.f32 %v1625_v42, %v1492_v22  ;;  %v1638_v8 = vpop.f32.mrf.mxu3  ;;  %v1601_v34 = vpop.f32.mrf.mxu0 }
 0x201   :  { %v1639_v41 = vadd.f32 %v1638_v8, %v1505_v48  ;;  %v1614_v12 = vpop.f32.mrf.mxu1 }
 0x207   :  { %v1627_v17 = vpop.f32.mrf.mxu2 }
 0x208   :  { %v1640_v18 = vpop.f32.mrf.mxu3  ;;  %v1651_v43 = vpop.f32.mrf.mxu0 }
 0x209   :  { %v1664_v23 = vpop.f32.mrf.mxu1  ;;  %v1652_v24 = vadd.f32 %v1651_v43, %v1518_v53 }
 0x20a   :  { %v1665_v26 = vadd.f32 %v1664_v23, %v1531_v19  ;;  %2908 = vmatmul.msk.bf16.vlgmr.msra.gmra.mxu0 %vm135_vm2, %v3440_v10 }
 0x20b   :  { %2584 = vmatpush.bf16.msra.mxu0 %v2540_v35 }
 0x20c   :  { %2909 = vmatmul.msk.bf16.vlgmr.msra.gmra.mxu1 %vm135_vm2, %v3440_v10  ;;  %2910 = vmatmul.msk.bf16.vlgmr.msra.gmra.mxu2 %vm135_vm2, %v3440_v10 }
 0x20d   :  { %2911 = vmatmul.msk.bf16.vlgmr.msra.gmra.mxu3 %vm135_vm2, %v3440_v10  ;;  %2597 = vmatpush.bf16.msra.mxu1 %v2543_v36 }
 0x20e   :  { %2610 = vmatpush.bf16.msra.mxu2 %v2546_v55  ;;  %2623 = vmatpush.bf16.msra.mxu3 %v2549_v38 }
 0x20f   :  { %v1736_v22 = vpop.f32.mrf.mxu2 }
 0x210   :  { %v1805_v45 = vadd.f32 %v1736_v22, %v1600_v63  ;;  %v1749_v47 = vpop.f32.mrf.mxu3  ;;  %v1653_v48 = vpop.f32.mrf.mxu0 }
 0x211   :  { %v1806_v37 = vadd.f32 %v1749_v47, %v1613_v6  ;;  %v1666_v51 = vpop.f32.mrf.mxu1 }
 0x217   :  { %v1738_v52 = vpop.f32.mrf.mxu2 }
 0x218   :  { %v1751_v46 = vpop.f32.mrf.mxu3  ;;  %v1762_v32 = vpop.f32.mrf.mxu0 }
 0x219   :  { %v1807_v49 = vadd.f32 %v1762_v32, %v1626_v9  ;;  %v1775_v50 = vpop.f32.mrf.mxu1 }
 0x21a   :  { %v1808_v53 = vadd.f32 %v1775_v50, %v1639_v41  ;;  %2912 = vmatmul.msk.bf16.vlgmr.msrb.gmra.mxu0 %vm135_vm2, %v3440_v10 }
 0x21c   :  { %2913 = vmatmul.msk.bf16.vlgmr.msrb.gmra.mxu1 %vm135_vm2, %v3440_v10  ;;  %2914 = vmatmul.msk.bf16.vlgmr.msrb.gmra.mxu2 %vm135_vm2, %v3495_v2 }
 0x21d   :  { %2915 = vmatmul.msk.bf16.vlgmr.msrb.gmra.mxu3 %vm135_vm2, %v3495_v2 }
 0x21f   :  { %v1788_v58 = vpop.f32.mrf.mxu2 }
 0x220   :  { %v1809_v19 = vadd.f32 %v1788_v58, %v1652_v24  ;;  %v1801_v57 = vpop.f32.mrf.mxu3  ;;  %v1764_v5 = vpop.f32.mrf.mxu0 }
 0x221   :  { %v1810_v54 = vadd.f32 %v1801_v57, %v1665_v26  ;;  %v1777_v27 = vpop.f32.mrf.mxu1 }
 0x227   :  { %v1790_v33 = vpop.f32.mrf.mxu2 }
 0x228   :  { %v1803_v59 = vpop.f32.mrf.mxu3  ;;  %v1879_v28 = vpop.f32.mrf.mxu0 }
 0x229   :  { %v1948_v30 = vadd.f32 %v1879_v28, %v1805_v45  ;;  %v1892_v60 = vpop.f32.mrf.mxu1 }
 0x22a   :  { %v1949_v61 = vadd.f32 %v1892_v60, %v1806_v37  ;;  %2916 = vmatmul.msk.bf16.vlgmr.msra.gmra.mxu0 %vm135_vm2, %v3495_v2 }
 0x22c   :  { %2917 = vmatmul.msk.bf16.vlgmr.msra.gmra.mxu1 %vm135_vm2, %v3495_v2  ;;  %2918 = vmatmul.msk.bf16.vlgmr.msra.gmra.mxu2 %vm135_vm2, %v3495_v2 }
 0x22d   :  { %2919 = vmatmul.msk.bf16.vlgmr.msra.gmra.mxu3 %vm135_vm2, %v3495_v2 }
 0x22f   :  { %v1905_v10 = vpop.f32.mrf.mxu2 }
 0x230   :  { %v1950_v40 = vadd.f32 %v1905_v10, %v1807_v49  ;;  %v1918_v63 = vpop.f32.mrf.mxu3  ;;  %v1881_v0 = vpop.f32.mrf.mxu0 }
 0x231   :  { %v1951_v4 = vadd.f32 %v1918_v63, %v1808_v53  ;;  %v1894_v6 = vpop.f32.mrf.mxu1 }
 0x237   :  { %v1907_v39 = vpop.f32.mrf.mxu2 }
 0x238   :  { %v1920_v7 = vpop.f32.mrf.mxu3  ;;  %v1931_v3 = vpop.f32.mrf.mxu0 }
 0x239   :  { %v1952_v44 = vadd.f32 %v1931_v3, %v1809_v19  ;;  %v1944_v42 = vpop.f32.mrf.mxu1 }
 0x23a   :  { %v1953_v9 = vadd.f32 %v1944_v42, %v1810_v54 }
 0x23f   :  { %v1988_v8 = vpop.f32.mrf.mxu2 }
 0x240   :  { %v2057_v34 = vadd.f32 %v1988_v8, %v1948_v30  ;;  %v2001_v41 = vpop.f32.mrf.mxu3  ;;  %v1933_v12 = vpop.f32.mrf.mxu0 }
 0x241   :  { %v2058_v14 = vadd.f32 %v2001_v41, %v1949_v61  ;;  %v1946_v29 = vpop.f32.mrf.mxu1  ;;  %v3733_v12 = vpop.permute.xlu1 %1383 }
 0x247   :  { %v1990_v15 = vpop.f32.mrf.mxu2 }
 0x248   :  { %v2003_v2 = vpop.f32.mrf.mxu3  ;;  %v2014_v17 = vpop.f32.mrf.mxu0 }
 0x249   :  { %v2059_v16 = vadd.f32 %v2014_v17, %v1950_v40  ;;  %v2027_v18 = vpop.f32.mrf.mxu1  ;;  %v1386_v17 = vadd.f32 %v3733_v12, %v3623_v56 }
 0x24a   :  { %v2060_v20 = vadd.f32 %v2027_v18, %v1951_v4 }
 0x24f   :  { %v2040_v43 = vpop.f32.mrf.mxu2 }
 0x250   :  { %v2061_v21 = vadd.f32 %v2040_v43, %v1952_v44  ;;  %v2053_v23 = vpop.f32.mrf.mxu3  ;;  %v2016_v24 = vpop.f32.mrf.mxu0  ;;  %v1387_v43 = vadd.f32 %v3733_v12, %v3626_v31 }
 0x251   :  { %v2062_v25 = vadd.f32 %v2053_v23, %v1953_v9  ;;  %v2029_v26 = vpop.f32.mrf.mxu1 }
 0x252   :  { %v84_v26 = vlaneseq }
 0x254   :  { %vm3741_vm10 = vcmp.lt.s32.totalorder %v84_v26, 768 }
 0x257   :  { %v2042_v35 = vpop.f32.mrf.mxu2 }
 0x258   :  { %v2055_v55 = vpop.f32.mrf.mxu3  ;;  %v2131_v36 = vpop.f32.mrf.mxu0  ;;  %v1392_v35 = vmax.f32 %v1386_v17, 0.0 }
 0x259   :  { %v2200_v38 = vadd.f32 %v2131_v36, %v2057_v34  ;;  %v2144_v22 = vpop.f32.mrf.mxu1 }
 0x25a   :  { %v2201_v45 = vadd.f32 %v2144_v22, %v2058_v14 }
 0x25f   :  { %v2157_v47 = vpop.f32.mrf.mxu2 }
 0x260   :  { %v2202_v48 = vadd.f32 %v2157_v47, %v2059_v16  ;;  %v2170_v37 = vpop.f32.mrf.mxu3  ;;  %v2133_v51 = vpop.f32.mrf.mxu0 }
 0x261   :  { %v2203_v52 = vadd.f32 %v2170_v37, %v2060_v20  ;;  %v2146_v46 = vpop.f32.mrf.mxu1 }
 0x262   :  { %v2949_v46 = vmov 0.0  }
 0x263   :  { %88 = vst.msk [vmem:[#allocation2] sm:$0x3f] %vm3741_vm10, %v2949_v46 }
 0x267   :  { %v2159_v32 = vpop.f32.mrf.mxu2 }
 0x268   :  { %v2172_v49 = vpop.f32.mrf.mxu3  ;;  %v2183_v50 = vpop.f32.mrf.mxu0  ;;  %v1388_v32 = vadd.f32 %v3733_v12, %v3639_v62  ;;  %v3756_v62 = vld [vmem:[%s3792_s2] sm:$0x3f] }
 0x269   :  { %v3727_v53 = vadd.f32 %v2183_v50, %v2061_v21  ;;  %v2196_v58 = vpop.f32.mrf.mxu1 }
 0x26a   :  { %v3729_v19 = vadd.f32 %v2196_v58, %v2062_v25 }
 0x26f   :  { %v2274_v57 = vpop.f32.mrf.mxu2 }
 0x270   :  { %v2287_v5 = vpop.f32.mrf.mxu3  ;;  %v2185_v54 = vpop.f32.mrf.mxu0  ;;  %v2343_v41 = vadd.f32 %v2274_v57, %v2200_v38  ;;  %v1393_v38 = vmax.f32 %v1387_v43, 0.0  ;;  %v1389_v57 = vadd.f32 %v3733_v12, %v3641_v1 }
 0x271   :  { %v2198_v27 = vpop.f32.mrf.mxu1  ;;  %v2344_v14 = vadd.f32 %v2287_v5, %v2201_v45 }
 0x272   :  { %v1395_v1 = vmax.f32 %v1389_v57, 0.0 }
 0x277   :  { %v2276_v33 = vpop.f32.mrf.mxu2 }
 0x278   :  { %v2289_v59 = vpop.f32.mrf.mxu3  ;;  %v2300_v28 = vpop.f32.mrf.mxu0 }
 0x279   :  { %v2313_v30 = vpop.f32.mrf.mxu1  ;;  %v2345_v36 = vadd.f32 %v2300_v28, %v2202_v48 }
 0x27a   :  { %v2346_v45 = vadd.f32 %v2313_v30, %v2203_v52  ;;  %v1394_v30 = vmax.f32 %v1388_v32, 0.0 }
 0x27f   :  { %v2326_v60 = vpop.f32.mrf.mxu2 }
 0x280   :  { %v3731_v61 = vpop.f32.mrf.mxu3  ;;  %v2302_v10 = vpop.f32.mrf.mxu0 }
 0x281   :  { %v2315_v40 = vpop.f32.mrf.mxu1  ;;  %v2347_v10 = vadd.f32 %v2326_v60, %v3727_v53 }
 0x287   :  { %v2328_v63 = vpop.f32.mrf.mxu2 }
 0x288   :  { %v2341_v0 = vpop.f32.mrf.mxu3  ;;  %v2417_v4 = vpop.f32.mrf.mxu0 }
 0x289   :  { %v2430_v6 = vpop.f32.mrf.mxu1  ;;  %v2486_v29 = vadd.f32 %v2417_v4, %v2343_v41  ;;  %v2348_v0 = vadd.f32 %v3731_v61, %v3729_v19 }
 0x28a   :  { %v2487_v15 = vadd.f32 %v2430_v6, %v2344_v14  ;;  %v1391_v14 = vadd.f32 %v3733_v12, %v3650_v13 }
 0x28f   :  { %v2443_v39 = vpop.f32.mrf.mxu2 }
 0x290   :  { %v2456_v7 = vpop.f32.mrf.mxu3  ;;  %v2419_v3 = vpop.f32.mrf.mxu0  ;;  %v2488_v37 = vadd.f32 %v2443_v39, %v2345_v36  ;;  %v1390_v39 = vadd.f32 %v3733_v12, %v3646_v11 }
 0x291   :  { %v2432_v44 = vpop.f32.mrf.mxu1  ;;  %v2489_v49 = vadd.f32 %v2456_v7, %v2346_v45 }
 0x292   :  { %v3764_v44 = vunpack.c.l.bf16 %v3756_v62 }
 0x294   :  { %v2701_v26 = vperm.slane %v3764_v44, 0 }
 0x297   :  { %v2445_v42 = vpop.f32.mrf.mxu2 }
 0x298   :  { %v2458_v9 = vpop.f32.mrf.mxu3  ;;  %v2469_v8 = vpop.f32.mrf.mxu0 }
 0x299   :  { %v2482_v34 = vpop.f32.mrf.mxu1  ;;  %v2490_v7 = vadd.f32 %v2469_v8, %v2347_v10 }
 0x29a   :  { %v2491_v60 = vadd.f32 %v2482_v34, %v2348_v0  ;;  %v2698_v0 = vunpack.c.h.bf16 %v3756_v62 }
 0x29f   :  { %v2560_v2 = vpop.f32.mrf.mxu2 }
 0x2a0   :  { %v2629_v16 = vadd.f32 %v2560_v2, %v2486_v29  ;;  %v2573_v18 = vpop.f32.mrf.mxu3  ;;  %v2471_v20 = vpop.f32.mrf.mxu0 }
 0x2a1   :  { %v2630_v21 = vadd.f32 %v2573_v18, %v2487_v15  ;;  %v2484_v23 = vpop.f32.mrf.mxu1  ;;  %v1396_v18 = vmax.f32 %v1390_v39, 0.0 }
 0x2a2   :  { %v2635_v24 = vadd.f32 %v2629_v16, %v3733_v12  ;;  %v2702_v23 = vperm.slane %v3764_v44, 2 }
 0x2a3   :  { %v2636_v25 = vadd.f32 %v2630_v21, %v3733_v12 }
 0x2a4   :  { %v2641_v55 = vmax.f32 %v2635_v24, 0.0 }
 0x2a5   :  { %v2642_v22 = vmax.f32 %v2636_v25, 0.0  ;;  %v1397_v25 = vmax.f32 %v1391_v14, 0.0  ;;  %v2706_v14 = vperm.slane %v2698_v0, 2 }
 0x2a6   :  { %v2647_v47 = vsub.f32 %v1392_v35, %v2641_v55 }
 0x2a7   :  { %v2648_v31 = vsub.f32 %v1393_v38, %v2642_v22  ;;  %v2562_v51 = vpop.f32.mrf.mxu2 }
 0x2a8   :  { %v2653_v48 = vmul.f32 %v2647_v47, %v2647_v47  ;;  %v2575_v50 = vpop.f32.mrf.mxu3  ;;  %v2586_v58 = vpop.f32.mrf.mxu0 }
 0x2a9   :  { %v2654_v5 = vmul.f32 %v2648_v31, %v2648_v31  ;;  %v2631_v52 = vadd.f32 %v2586_v58, %v2488_v37  ;;  %v2599_v54 = vpop.f32.mrf.mxu1 }
 0x2aa   :  { %v2659_v27 = vrot.slane %v2653_v48, 4  ;;  %v2632_v33 = vadd.f32 %v2599_v54, %v2489_v49 }
 0x2ab   :  { %v2665_v59 = vrot.slane %v2654_v5, 4  ;;  %v2637_v28 = vadd.f32 %v2631_v52, %v3733_v12 }
 0x2ac   :  { %v2660_v40 = vadd.f32 %v2659_v27, %v2653_v48  ;;  %v2638_v63 = vadd.f32 %v2632_v33, %v3733_v12  ;;  %v2703_v33 = vperm.slane %v3764_v44, 4 }
 0x2ad   :  { %v2666_v4 = vadd.f32 %v2665_v59, %v2654_v5  ;;  %v2643_v6 = vmax.f32 %v2637_v28, 0.0 }
 0x2ae   :  { %v2661_v3 = vrot.slane %v2660_v40, 2  ;;  %v2644_v53 = vmax.f32 %v2638_v63, 0.0 }
 0x2af   :  { %v2667_v42 = vrot.slane %v2666_v4, 2  ;;  %v2649_v9 = vsub.f32 %v1394_v30, %v2643_v6  ;;  %v2612_v41 = vpop.f32.mrf.mxu2 }
 0x2b0   :  { %v2662_v29 = vadd.f32 %v2661_v3, %v2660_v40  ;;  %v2650_v19 = vsub.f32 %v1395_v1, %v2644_v53  ;;  %v2633_v61 = vadd.f32 %v2612_v41, %v2490_v7  ;;  %v2625_v15 = vpop.f32.mrf.mxu3  ;;  %v2588_v2 = vpop.f32.mrf.mxu0  ;;  %v2704_v7 = vperm.slane %v3764_v44, 6 }
 0x2b1   :  { %v2668_v17 = vadd.f32 %v2667_v42, %v2666_v4  ;;  %v2655_v11 = vmul.f32 %v2649_v9, %v2649_v9  ;;  %v2634_v8 = vadd.f32 %v2625_v15, %v2491_v60  ;;  %v2601_v16 = vpop.f32.mrf.mxu1  ;;  %v2705_v9 = vperm.slane %v2698_v0, 0 }
 0x2b2   :  { %v2663_v34 = vrot.slane %v2662_v29, 1  ;;  %v2656_v20 = vmul.f32 %v2650_v19, %v2650_v19  ;;  %v2639_v43 = vadd.f32 %v2633_v61, %v3733_v12  ;;  %v2695_v16 = vld [vmem:[#allocation2] sm:$0x3f] }
 0x2b3   :  { %v2669_v21 = vrot.slane %v2668_v17, 1  ;;  %v2671_v24 = vrot.slane %v2655_v11, 4  ;;  %v2640_v13 = vadd.f32 %v2634_v8, %v3733_v12 }
 0x2b4   :  { %v2677_v35 = vrot.slane %v2656_v20, 4  ;;  %v2645_v55 = vmax.f32 %v2639_v43, 0.0  ;;  %v2664_v36 = vadd.f32 %v2663_v34, %v2662_v29 }
 0x2b5   :  { %v2670_v38 = vadd.f32 %v2669_v21, %v2668_v17  ;;  %v2672_v22 = vadd.f32 %v2671_v24, %v2655_v11  ;;  %v2646_v45 = vmax.f32 %v2640_v13, 0.0 }
 0x2b6   :  { %v2678_v47 = vadd.f32 %v2677_v35, %v2656_v20  ;;  %v2651_v37 = vsub.f32 %v1396_v18, %v2645_v55  ;;  %v2713_v12 = vmul.f32 %v2701_v26, %v2664_v36 }
 0x2b7   :  { %v2714_v31 = vmul.f32 %v2702_v23, %v2670_v38  ;;  %v2673_v51 = vrot.slane %v2672_v22, 2  ;;  %v2652_v46 = vsub.f32 %v1397_v25, %v2646_v45  ;;  %v2614_v32 = vpop.f32.mrf.mxu2 }
 0x2b8   :  { %v2679_v49 = vrot.slane %v2678_v47, 2  ;;  %v2657_v48 = vmul.f32 %v2651_v37, %v2651_v37  ;;  %v2627_v50 = vpop.f32.mrf.mxu3 }
 0x2b9   :  { %v2725_v58 = vrot.slane %v2714_v31, 7  ;;  %v2674_v57 = vadd.f32 %v2673_v51, %v2672_v22  ;;  %v2658_v5 = vmul.f32 %v2652_v46, %v2652_v46 }
 0x2ba   :  { %v2680_v52 = vadd.f32 %v2679_v49, %v2678_v47  ;;  %v2683_v54 = vrot.slane %v2657_v48, 4 }
 0x2bb   :  { %v2675_v27 = vrot.slane %v2674_v57, 1  ;;  %v2689_v59 = vrot.slane %v2658_v5, 4  ;;  %v2731_v28 = vsel %vm2730_vm11, %v2713_v12, %v2725_v58 }
 0x2bc   :  { %v2681_v30 = vrot.slane %v2680_v52, 1  ;;  %v2684_v10 = vadd.f32 %v2683_v54, %v2657_v48 }
 0x2bd   :  { %v2676_v40 = vadd.f32 %v2675_v27, %v2674_v57  ;;  %v2690_v63 = vadd.f32 %v2689_v59, %v2658_v5 }
 0x2be   :  { %v2685_v1 = vrot.slane %v2684_v10, 2  ;;  %v2682_v39 = vadd.f32 %v2681_v30, %v2680_v52 }
 0x2bf   :  { %v2715_v4 = vmul.f32 %v2703_v33, %v2676_v40  ;;  %v2691_v6 = vrot.slane %v2690_v63, 2 }
 0x2c0   :  { %v2686_v3 = vadd.f32 %v2685_v1, %v2684_v10  ;;  %v2716_v19 = vmul.f32 %v2704_v7, %v2682_v39 }
 0x2c1   :  { %v2726_v53 = vrot.slane %v2715_v4, 6  ;;  %v2692_v60 = vadd.f32 %v2691_v6, %v2690_v63 }
 0x2c2   :  { %v2687_v42 = vrot.slane %v2686_v3, 1  ;;  %v2727_v17 = vrot.slane %v2716_v19, 5 }
 0x2c3   :  { %v2693_v41 = vrot.slane %v2692_v60, 1  ;;  %v2732_v29 = vsel %vm139_vm1, %v2731_v28, %v2726_v53 }
 0x2c4   :  { %v2688_v61 = vadd.f32 %v2687_v42, %v2686_v3 }
 0x2c5   :  { %v2694_v15 = vadd.f32 %v2693_v41, %v2692_v60 }
 0x2c6   :  { %v2717_v2 = vmul.f32 %v2705_v9, %v2688_v61 }
 0x2c7   :  { %v2718_v62 = vmul.f32 %v2706_v14, %v2694_v15 }
 0x2c8   :  { %v2728_v11 = vrot.slane %v2717_v2, 4 }
 0x2c9   :  { %v2729_v8 = vrot.slane %v2718_v62, 3 }
 0x2ca   :  { %v2734_v44 = vsel %vm2733_vm12, %v2727_v17, %v2728_v11 }
 0x2cb   :  { %v2736_v18 = vsel %vm2735_vm13, %v2734_v44, %v2729_v8 }
 0x2cc   :  { %v2738_v34 = vsel %vm2737_vm14, %v2732_v29, %v2736_v18 }
 0x2cd   :  { %v2740_v20 = vadd.f32 %v2738_v34, %v2695_v16 }
 0x2cf   :  { %2745 = vst.msk [vmem:[#allocation2] sm:$0x3f] %vm3741_vm10, %v2740_v20 }
 0x2d6   :  { %v2749_v43 = vld [vmem:[#allocation2] sm:$0x3f] }
 0x2d7   :  { %v2751_v21 = vperm.slane %v2749_v43, 0  ;;  %v2752_v23 = vperm.slane %v2749_v43, 1  ;;  %v2753_v24 = vperm.slane %v2749_v43, 2  ;;  %v2754_v13 = vperm.slane %v2749_v43, 3 }
 0x2d8   :  { %v2755_v55 = vperm.slane %v2749_v43, 4  ;;  %v2756_v22 = vperm.slane %v2749_v43, 5 }
 0x2d9   :  { %v2763_v25 = vsel %vm2730_vm11, %v2751_v21, 0.0  ;;  %v2764_v26 = vsel %vm2730_vm11, %v2752_v23, 0.0  ;;  %v2766_v36 = vsel %vm2730_vm11, %v2753_v24, 0.0  ;;  %v2768_v45 = vsel %vm2730_vm11, %v2754_v13, 0.0 }
 0x2da   :  { %v2765_v35 = vadd.f32 %v2764_v26, %v2763_v25  ;;  %v2770_v56 = vsel %vm2730_vm11, %v2755_v55, 0.0  ;;  %v2772_v31 = vsel %vm2730_vm11, %v2756_v22, 0.0 }
 0x2dc   :  { %v2767_v38 = vadd.f32 %v2766_v36, %v2765_v35 }
 0x2de   :  { %v2769_v47 = vadd.f32 %v2768_v45, %v2767_v38 }
 0x2e0   :  { %v2771_v37 = vadd.f32 %v2770_v56, %v2769_v47 }
 0x2e2   :  { %v2773_v51 = vadd.f32 %v2772_v31, %v2771_v37 }
 0x2e4   :  { %2774 = vadd.xlane.f32.xlu2 %v2773_v51 }
 0x357   :  { %v2775_v46 = vpop.xlane.xlu2 %2774 }
 0x358   :  { %v2776_v32 = vrot.slane %v2775_v46, 4 }
 0x35a   :  { %v2777_v49 = vadd.f32 %v2776_v32, %v2775_v46 }
 0x35c   :  { %v2778_v48 = vrot.slane %v2777_v49, 2 }
 0x35e   :  { %v2779_v50 = vadd.f32 %v2778_v48, %v2777_v49 }
 0x360   :  { %v2780_v12 = vrot.slane %v2779_v50, 1 }
 0x362   :  { %v2781_v58 = vadd.f32 %v2780_v12, %v2779_v50 }
 0x364   :  { %2920 = vpush %v2781_v58 }
 0x395   :  { %s2921_s2 = spop %2920 }
 0x396   :  { %v2783_v57 = vstv %s2921_s2 }
 0x397   :  { %2784 = vst [vmem:[%s3793_s5] sm:$0xff] %v2783_v57 }

</bundles_post_ra>
